<compile_context>
chip_gen: v6e
topology: v6e:2x2x1
jax: 0.10.0
libtpu: 0.0.40
codegen_flags: <defaults>
</compile_context>

<pallas_src>
import functools

import jax
import jax.numpy as jnp
from jax.experimental import pallas as pl

KH = KW = 3  # fe is a 3x3, padding=1 conv


def _round_up(x, m):
    return -(-x // m) * m


# ----------------------------- Pallas kernel -------------------------------

def multi_image_kernel(xp_ref, wc_ref, pool_ref, fcw_img_ref, x11_ref,
                       fcw_x_ref, out_ref, *, n_img, bpad):
    """Fused fe (3x3 conv + ReLU) + avg-pool + concat + Linear for all images.

    xp_ref:      (n_img*B*H, Kpad)       bf16  im2row-packed images (+ ones lane)
    wc_ref:      (Kpad, W*Cout)          bf16  merged 9-tap conv weight (+ bias row)
    pool_ref:    (n_img*bpad, n_img*B*H) bf16  (1/(H*W))-scaled h-pool matrix
    fcw_img_ref: (n_img, W*Cout, NCpad)  bf16  per-image clf weight, w-replicated
    x11_ref:     (bpad, DXpad)           bf16  extra features (+ ones lane)
    fcw_x_ref:   (DXpad, NCpad)          bf16  clf weight for x11 (+ clf-bias row)
    out_ref:     (bpad, NCpad)           f32
    """
    # fe: whole 3x3 conv (bias included) as one K-padded bf16 MXU matmul; ReLU
    # in f32, then cast back to bf16 for the pooling matmul.
    acts = jnp.maximum(
        jnp.dot(xp_ref[...], wc_ref[...], preferred_element_type=jnp.float32),
        0.0).astype(jnp.bfloat16)                                   # (R, 128)

    # AdaptiveAvgPool2d((1,1)): h-sum via MXU with 1/(H*W) folded into pool_ref;
    # the w-sum is folded into the w-replicated classifier weights below.
    rp = jnp.dot(pool_ref[...], acts,
                 preferred_element_type=jnp.float32).astype(jnp.bfloat16)

    # clf: x11 part (classifier bias folded in via the ones lane) plus per-image
    # accumulation over aligned 8-row blocks of rp -- replaces the old 10-piece
    # lane concat + wide replicated-weight matmul.
    out = jnp.dot(x11_ref[...], fcw_x_ref[...],
                  preferred_element_type=jnp.float32)               # (bpad, NCpad)
    for i in range(n_img):
        out = out + jnp.dot(rp[i * bpad:(i + 1) * bpad, :], fcw_img_ref[i],
                            preferred_element_type=jnp.float32)
    out_ref[...] = out


# -------------------- one-time parameter repacking (hoisted) ----------------

def pack_params(conv_w, conv_b, fc_w, fc_b, *, n_img, B, H, W,
                ncls_pad=128, dx_pad=128):
    """Repack fe/clf parameters into MXU-friendly layouts. Call ONCE."""
    Cout, Cin, _, _ = conv_w.shape
    Wp = W + KW - 1
    L = W * Cout
    k_data = KH * Wp * Cin
    kpad = _round_up(k_data + 1, 128)           # +1 for the conv-bias ones lane
    P = H * W
    n_classes = fc_w.shape[1]
    D_extra = fc_w.shape[0] - n_img * Cout
    bpad = _round_up(B, 8)

    # Merged conv weight: maps packed input lanes (kh, w_out+kw, ci) to packed
    # output lanes (w_out, co) for all 9 taps at once; final data row carries the
    # conv bias (picked up by the ones lane appended to xp).
    wc = jnp.zeros((k_data, L), jnp.float32)
    for kh in range(KH):
        for kw in range(KW):
            tap = conv_w[:, :, kh, kw].T                            # (Cin, Cout)
            shift = jnp.zeros((Wp, W), jnp.float32)
            shift = shift.at[jnp.arange(W) + kw, jnp.arange(W)].set(1.0)
            block = jnp.kron(shift, tap)                            # (Wp*Cin, L)
            wc = wc.at[kh * Wp * Cin:(kh + 1) * Wp * Cin, :].add(block)
    bias_row = jnp.tile(conv_b, W).reshape(1, L)
    wc = jnp.concatenate([wc, bias_row], axis=0)
    wc = jnp.pad(wc, ((0, kpad - k_data - 1), (0, 0))).astype(jnp.bfloat16)

    # (1/(H*W))-scaled h-pool matrix; output rows ordered (image, padded-batch)
    # in aligned 8-row blocks so the per-image classifier dots slice cleanly.
    R = n_img * B * H
    Np = n_img * bpad
    row_img = jnp.arange(R) // (B * H)
    row_b = (jnp.arange(R) // H) % B
    out_img = jnp.arange(Np) // bpad
    out_b = jnp.arange(Np) % bpad
    pool = ((row_img[None, :] == out_img[:, None]) &
            (row_b[None, :] == out_b[:, None]) &
            (out_b[:, None] < B)).astype(jnp.float32) / P
    pool = pool.astype(jnp.bfloat16)                                # (Np, R)

    # Per-image classifier weights, replicated over w (folds the pool's w-sum),
    # lane-padded to NCpad: (n_img, W*Cout, NCpad) bf16.
    fcw_img = fc_w[:n_img * Cout].reshape(n_img, Cout, n_classes)
    fcw_img = jnp.tile(fcw_img, (1, W, 1))
    fcw_img = jnp.pad(
        fcw_img, ((0, 0), (0, 0), (0, ncls_pad - n_classes))).astype(jnp.bfloat16)

    # x11 classifier weight with the classifier bias folded in as an extra row
    # (matching the ones lane appended to x11), padded lane-dense.
    fcw_x = jnp.concatenate([fc_w[n_img * Cout:], fc_b.reshape(1, n_classes)],
                            axis=0)
    fcw_x = jnp.pad(
        fcw_x, ((0, dx_pad - D_extra - 1),
                (0, ncls_pad - n_classes))).astype(jnp.bfloat16)

    return dict(wc=wc, pool=pool, fcw_img=fcw_img, fcw_x=fcw_x)


# ------------------------------- JAX glue -----------------------------------

def multi_image_forward(images_nchw, x11, params, *, n_classes):
    """images_nchw: (n_img, B, Cin, H, W) -- the tuple (x1..x10) stacked.
       x11:         (B, D_extra).  params: output of pack_params()."""
    n_img, B, Cin, H, W = images_nchw.shape
    Wp = W + KW - 1
    k_data = KH * Wp * Cin
    kpad, _L = params["wc"].shape
    dx_pad, ncls_pad = params["fcw_x"].shape
    bpad = _round_up(B, 8)
    R = n_img * B * H

    # NCHW -> NHWC, zero-pad the h/w border, pack the KH row shifts into the lane
    # dim so the whole 3x3 conv is ONE aligned matmul; a trailing ones lane picks
    # up the conv-bias row of the merged weight.  Everything here is per-call
    # input packing only (parameter packing lives in pack_params).
    imgs = jnp.transpose(images_nchw, (0, 1, 3, 4, 2))              # (n,B,H,W,Cin)
    imgs = jnp.pad(imgs, ((0, 0), (0, 0), (1, 1), (1, 1), (0, 0)))  # (n,B,Hp,Wp,Cin)
    imgs = imgs.reshape(n_img, B, H + KH - 1, Wp * Cin)
    rows = jnp.concatenate([imgs[:, :, kh:kh + H, :] for kh in range(KH)],
                           axis=-1)                                 # (n,B,H,3*Wp*Cin)
    xp = rows.reshape(R, k_data)
    xp = jnp.concatenate([xp, jnp.ones((R, 1), xp.dtype)], axis=-1)
    xp = jnp.pad(xp, ((0, 0), (0, kpad - k_data - 1))).astype(jnp.bfloat16)

    # x11 with a ones lane (picks up the classifier-bias row), padded lane-dense.
    x11a = jnp.concatenate([x11, jnp.ones((B, 1), x11.dtype)], axis=-1)
    x11p = jnp.pad(x11a, ((0, bpad - B),
                          (0, dx_pad - x11a.shape[1]))).astype(jnp.bfloat16)

    kernel = functools.partial(multi_image_kernel, n_img=n_img, bpad=bpad)

    out = pl.pallas_call(
        kernel,
        out_shape=jax.ShapeDtypeStruct((bpad, ncls_pad), jnp.float32),
        in_specs=[
            pl.BlockSpec(xp.shape, lambda: (0, 0)),
            pl.BlockSpec(params["wc"].shape, lambda: (0, 0)),
            pl.BlockSpec(params["pool"].shape, lambda: (0, 0)),
            pl.BlockSpec(params["fcw_img"].shape, lambda: (0, 0, 0)),
            pl.BlockSpec(x11p.shape, lambda: (0, 0)),
            pl.BlockSpec(params["fcw_x"].shape, lambda: (0, 0)),
        ],
        out_specs=pl.BlockSpec((bpad, ncls_pad), lambda: (0, 0)),
    )(xp, params["wc"], params["pool"], params["fcw_img"], x11p, params["fcw_x"])

    return out[:B, :n_classes]


# Pure-JAX reference (mirrors the PyTorch module with the synthetic fe/clf).
def reference_forward(images_nchw, x11, conv_w, conv_b, fc_w, fc_b):
    n_img, B, Cin, H, W = images_nchw.shape
    Cout = conv_w.shape[0]
    imgs = images_nchw.reshape(n_img * B, Cin, H, W)
    conv = jax.lax.conv_general_dilated(
        imgs, conv_w, window_strides=(1, 1), padding="SAME",
        dimension_numbers=("NCHW", "OIHW", "NCHW"))
    acts = jnp.maximum(conv + conv_b[None, :, None, None], 0.0)
    pooled = acts.mean(axis=(2, 3))                                 # (n_img*B, Cout)
    f = pooled.reshape(n_img, B, Cout).transpose(1, 0, 2).reshape(B, n_img * Cout)
    f = jnp.concatenate([f, x11], axis=1)
    return f @ fc_w + fc_b


# --------------------------------- main --------------------------------------

if __name__ == "__main__":
    B, Cin, H, W = 2, 3, 16, 16
    Cout, n_img, D_extra, n_classes = 8, 10, 8, 5

    key = jax.random.PRNGKey(0)
    k_img, k_x11, k_cw, k_cb, k_fw, k_fb = jax.random.split(key, 6)

    # Inputs: x1..x10 stacked, plus x11 (extra feature vector).
    images = jax.random.normal(k_img, (n_img, B, Cin, H, W), jnp.float32)
    x11 = jax.random.normal(k_x11, (B, D_extra), jnp.float32)

    # Deterministic synthetic parameters (PyTorch-layout shapes).
    conv_w = 0.1 * jax.random.normal(k_cw, (Cout, Cin, 3, 3), jnp.float32)
    conv_b = 0.1 * jax.random.normal(k_cb, (Cout,), jnp.float32)
    fc_w = 0.1 * jax.random.normal(k_fw, (n_img * Cout + D_extra, n_classes),
                                   jnp.float32)
    fc_b = 0.1 * jax.random.normal(k_fb, (n_classes,), jnp.float32)

    # One-time parameter repacking, hoisted out of the per-call jitted path.
    params = pack_params(conv_w, conv_b, fc_w, fc_b, n_img=n_img, B=B, H=H, W=W)

    fwd = jax.jit(functools.partial(multi_image_forward, n_classes=n_classes))
    out = jax.block_until_ready(fwd(images, x11, params))
    assert out.shape == (B, n_classes), out.shape

    ref = reference_forward(images, x11, conv_w, conv_b, fc_w, fc_b)
    max_err = float(jnp.max(jnp.abs(out - ref)))
    # bf16 matmul operands with f32 accumulation; observed error ~1e-3.
    assert max_err < 2e-2, f"mismatch vs reference: max_err={max_err}"

    print("KERNEL_OK")
</pallas_src>

<mosaic_0001>
module attributes {stable_mosaic.version = 11 : i64} {
  func.func @multi_image_kernel(%arg0: memref<320x256xbf16, #tpu.memory_space<vmem>>, %arg1: memref<256x128xbf16, #tpu.memory_space<vmem>>, %arg2: memref<80x320xbf16, #tpu.memory_space<vmem>>, %arg3: memref<10x128x128xbf16, #tpu.memory_space<vmem>>, %arg4: memref<8x128xbf16, #tpu.memory_space<vmem>>, %arg5: memref<128x128xbf16, #tpu.memory_space<vmem>>, %arg6: memref<8x128xf32, #tpu.memory_space<vmem>>) attributes {dimension_semantics = [], scalar_prefetch = 0 : i64, scratch_operands = 0 : i64, tpu.core_type = #tpu.core_type<tc>} {
    %c0 = arith.constant 0 : index
    %c0_0 = arith.constant 0 : index
    %0 = vector.load %arg0[%c0, %c0_0] : memref<320x256xbf16, #tpu.memory_space<vmem>>, vector<320x256xbf16>
    %c0_1 = arith.constant 0 : index
    %c0_2 = arith.constant 0 : index
    %1 = vector.load %arg1[%c0_1, %c0_2] : memref<256x128xbf16, #tpu.memory_space<vmem>>, vector<256x128xbf16>
    %cst = arith.constant dense<0.000000e+00> : vector<320x128xf32>
    %2 = tpu.matmul %0, %1, %cst {dimension_numbers = #tpu.dot_dimension_numbers<[1], [0], [0], [1], [0, 0, 1, 1], [], []>} : vector<320x256xbf16>, vector<256x128xbf16>, vector<320x128xf32> -> vector<320x128xf32>
    %cst_3 = arith.constant 0.000000e+00 : f32
    %3 = vector.broadcast %cst_3 : f32 to vector<320x128xf32>
    %4 = arith.maximumf %2, %3 : vector<320x128xf32>
    %5 = arith.truncf %4 : vector<320x128xf32> to vector<320x128xbf16>
    %c0_4 = arith.constant 0 : index
    %c0_5 = arith.constant 0 : index
    %6 = vector.load %arg2[%c0_4, %c0_5] : memref<80x320xbf16, #tpu.memory_space<vmem>>, vector<80x320xbf16>
    %cst_6 = arith.constant dense<0.000000e+00> : vector<80x128xf32>
    %7 = tpu.matmul %6, %5, %cst_6 {dimension_numbers = #tpu.dot_dimension_numbers<[1], [0], [0], [1], [0, 0, 1, 1], [], []>} : vector<80x320xbf16>, vector<320x128xbf16>, vector<80x128xf32> -> vector<80x128xf32>
    %8 = arith.truncf %7 : vector<80x128xf32> to vector<80x128xbf16>
    %c0_7 = arith.constant 0 : index
    %c0_8 = arith.constant 0 : index
    %9 = vector.load %arg4[%c0_7, %c0_8] : memref<8x128xbf16, #tpu.memory_space<vmem>>, vector<8x128xbf16>
    %c0_9 = arith.constant 0 : index
    %c0_10 = arith.constant 0 : index
    %10 = vector.load %arg5[%c0_9, %c0_10] : memref<128x128xbf16, #tpu.memory_space<vmem>>, vector<128x128xbf16>
    %cst_11 = arith.constant dense<0.000000e+00> : vector<8x128xf32>
    %11 = tpu.matmul %9, %10, %cst_11 {dimension_numbers = #tpu.dot_dimension_numbers<[1], [0], [0], [1], [0, 0, 1, 1], [], []>} : vector<8x128xbf16>, vector<128x128xbf16>, vector<8x128xf32> -> vector<8x128xf32>
    %12 = vector.extract_strided_slice %8 {offsets = [0, 0], sizes = [8, 128], strides = [1, 1]} : vector<80x128xbf16> to vector<8x128xbf16>
    %c0_12 = arith.constant 0 : index
    %c0_13 = arith.constant 0 : index
    %c0_14 = arith.constant 0 : index
    %13 = vector.load %arg3[%c0_12, %c0_13, %c0_14] : memref<10x128x128xbf16, #tpu.memory_space<vmem>>, vector<1x128x128xbf16>
    %14 = vector.shape_cast %13 : vector<1x128x128xbf16> to vector<128x128xbf16>
    %cst_15 = arith.constant dense<0.000000e+00> : vector<8x128xf32>
    %15 = tpu.matmul %12, %14, %cst_15 {dimension_numbers = #tpu.dot_dimension_numbers<[1], [0], [0], [1], [0, 0, 1, 1], [], []>} : vector<8x128xbf16>, vector<128x128xbf16>, vector<8x128xf32> -> vector<8x128xf32>
    %16 = arith.addf %11, %15 : vector<8x128xf32>
    %17 = vector.extract_strided_slice %8 {offsets = [8, 0], sizes = [8, 128], strides = [1, 1]} : vector<80x128xbf16> to vector<8x128xbf16>
    %c1 = arith.constant 1 : index
    %c0_16 = arith.constant 0 : index
    %c0_17 = arith.constant 0 : index
    %18 = vector.load %arg3[%c1, %c0_16, %c0_17] : memref<10x128x128xbf16, #tpu.memory_space<vmem>>, vector<1x128x128xbf16>
    %19 = vector.shape_cast %18 : vector<1x128x128xbf16> to vector<128x128xbf16>
    %cst_18 = arith.constant dense<0.000000e+00> : vector<8x128xf32>
    %20 = tpu.matmul %17, %19, %cst_18 {dimension_numbers = #tpu.dot_dimension_numbers<[1], [0], [0], [1], [0, 0, 1, 1], [], []>} : vector<8x128xbf16>, vector<128x128xbf16>, vector<8x128xf32> -> vector<8x128xf32>
    %21 = arith.addf %16, %20 : vector<8x128xf32>
    %22 = vector.extract_strided_slice %8 {offsets = [16, 0], sizes = [8, 128], strides = [1, 1]} : vector<80x128xbf16> to vector<8x128xbf16>
    %c2 = arith.constant 2 : index
    %c0_19 = arith.constant 0 : index
    %c0_20 = arith.constant 0 : index
    %23 = vector.load %arg3[%c2, %c0_19, %c0_20] : memref<10x128x128xbf16, #tpu.memory_space<vmem>>, vector<1x128x128xbf16>
    %24 = vector.shape_cast %23 : vector<1x128x128xbf16> to vector<128x128xbf16>
    %cst_21 = arith.constant dense<0.000000e+00> : vector<8x128xf32>
    %25 = tpu.matmul %22, %24, %cst_21 {dimension_numbers = #tpu.dot_dimension_numbers<[1], [0], [0], [1], [0, 0, 1, 1], [], []>} : vector<8x128xbf16>, vector<128x128xbf16>, vector<8x128xf32> -> vector<8x128xf32>
    %26 = arith.addf %21, %25 : vector<8x128xf32>
    %27 = vector.extract_strided_slice %8 {offsets = [24, 0], sizes = [8, 128], strides = [1, 1]} : vector<80x128xbf16> to vector<8x128xbf16>
    %c3 = arith.constant 3 : index
    %c0_22 = arith.constant 0 : index
    %c0_23 = arith.constant 0 : index
    %28 = vector.load %arg3[%c3, %c0_22, %c0_23] : memref<10x128x128xbf16, #tpu.memory_space<vmem>>, vector<1x128x128xbf16>
    %29 = vector.shape_cast %28 : vector<1x128x128xbf16> to vector<128x128xbf16>
    %cst_24 = arith.constant dense<0.000000e+00> : vector<8x128xf32>
    %30 = tpu.matmul %27, %29, %cst_24 {dimension_numbers = #tpu.dot_dimension_numbers<[1], [0], [0], [1], [0, 0, 1, 1], [], []>} : vector<8x128xbf16>, vector<128x128xbf16>, vector<8x128xf32> -> vector<8x128xf32>
    %31 = arith.addf %26, %30 : vector<8x128xf32>
    %32 = vector.extract_strided_slice %8 {offsets = [32, 0], sizes = [8, 128], strides = [1, 1]} : vector<80x128xbf16> to vector<8x128xbf16>
    %c4 = arith.constant 4 : index
    %c0_25 = arith.constant 0 : index
    %c0_26 = arith.constant 0 : index
    %33 = vector.load %arg3[%c4, %c0_25, %c0_26] : memref<10x128x128xbf16, #tpu.memory_space<vmem>>, vector<1x128x128xbf16>
    %34 = vector.shape_cast %33 : vector<1x128x128xbf16> to vector<128x128xbf16>
    %cst_27 = arith.constant dense<0.000000e+00> : vector<8x128xf32>
    %35 = tpu.matmul %32, %34, %cst_27 {dimension_numbers = #tpu.dot_dimension_numbers<[1], [0], [0], [1], [0, 0, 1, 1], [], []>} : vector<8x128xbf16>, vector<128x128xbf16>, vector<8x128xf32> -> vector<8x128xf32>
    %36 = arith.addf %31, %35 : vector<8x128xf32>
    %37 = vector.extract_strided_slice %8 {offsets = [40, 0], sizes = [8, 128], strides = [1, 1]} : vector<80x128xbf16> to vector<8x128xbf16>
    %c5 = arith.constant 5 : index
    %c0_28 = arith.constant 0 : index
    %c0_29 = arith.constant 0 : index
    %38 = vector.load %arg3[%c5, %c0_28, %c0_29] : memref<10x128x128xbf16, #tpu.memory_space<vmem>>, vector<1x128x128xbf16>
    %39 = vector.shape_cast %38 : vector<1x128x128xbf16> to vector<128x128xbf16>
    %cst_30 = arith.constant dense<0.000000e+00> : vector<8x128xf32>
    %40 = tpu.matmul %37, %39, %cst_30 {dimension_numbers = #tpu.dot_dimension_numbers<[1], [0], [0], [1], [0, 0, 1, 1], [], []>} : vector<8x128xbf16>, vector<128x128xbf16>, vector<8x128xf32> -> vector<8x128xf32>
    %41 = arith.addf %36, %40 : vector<8x128xf32>
    %42 = vector.extract_strided_slice %8 {offsets = [48, 0], sizes = [8, 128], strides = [1, 1]} : vector<80x128xbf16> to vector<8x128xbf16>
    %c6 = arith.constant 6 : index
    %c0_31 = arith.constant 0 : index
    %c0_32 = arith.constant 0 : index
    %43 = vector.load %arg3[%c6, %c0_31, %c0_32] : memref<10x128x128xbf16, #tpu.memory_space<vmem>>, vector<1x128x128xbf16>
    %44 = vector.shape_cast %43 : vector<1x128x128xbf16> to vector<128x128xbf16>
    %cst_33 = arith.constant dense<0.000000e+00> : vector<8x128xf32>
    %45 = tpu.matmul %42, %44, %cst_33 {dimension_numbers = #tpu.dot_dimension_numbers<[1], [0], [0], [1], [0, 0, 1, 1], [], []>} : vector<8x128xbf16>, vector<128x128xbf16>, vector<8x128xf32> -> vector<8x128xf32>
    %46 = arith.addf %41, %45 : vector<8x128xf32>
    %47 = vector.extract_strided_slice %8 {offsets = [56, 0], sizes = [8, 128], strides = [1, 1]} : vector<80x128xbf16> to vector<8x128xbf16>
    %c7 = arith.constant 7 : index
    %c0_34 = arith.constant 0 : index
    %c0_35 = arith.constant 0 : index
    %48 = vector.load %arg3[%c7, %c0_34, %c0_35] : memref<10x128x128xbf16, #tpu.memory_space<vmem>>, vector<1x128x128xbf16>
    %49 = vector.shape_cast %48 : vector<1x128x128xbf16> to vector<128x128xbf16>
    %cst_36 = arith.constant dense<0.000000e+00> : vector<8x128xf32>
    %50 = tpu.matmul %47, %49, %cst_36 {dimension_numbers = #tpu.dot_dimension_numbers<[1], [0], [0], [1], [0, 0, 1, 1], [], []>} : vector<8x128xbf16>, vector<128x128xbf16>, vector<8x128xf32> -> vector<8x128xf32>
    %51 = arith.addf %46, %50 : vector<8x128xf32>
    %52 = vector.extract_strided_slice %8 {offsets = [64, 0], sizes = [8, 128], strides = [1, 1]} : vector<80x128xbf16> to vector<8x128xbf16>
    %c8 = arith.constant 8 : index
    %c0_37 = arith.constant 0 : index
    %c0_38 = arith.constant 0 : index
    %53 = vector.load %arg3[%c8, %c0_37, %c0_38] : memref<10x128x128xbf16, #tpu.memory_space<vmem>>, vector<1x128x128xbf16>
    %54 = vector.shape_cast %53 : vector<1x128x128xbf16> to vector<128x128xbf16>
    %cst_39 = arith.constant dense<0.000000e+00> : vector<8x128xf32>
    %55 = tpu.matmul %52, %54, %cst_39 {dimension_numbers = #tpu.dot_dimension_numbers<[1], [0], [0], [1], [0, 0, 1, 1], [], []>} : vector<8x128xbf16>, vector<128x128xbf16>, vector<8x128xf32> -> vector<8x128xf32>
    %56 = arith.addf %51, %55 : vector<8x128xf32>
    %57 = vector.extract_strided_slice %8 {offsets = [72, 0], sizes = [8, 128], strides = [1, 1]} : vector<80x128xbf16> to vector<8x128xbf16>
    %c9 = arith.constant 9 : index
    %c0_40 = arith.constant 0 : index
    %c0_41 = arith.constant 0 : index
    %58 = vector.load %arg3[%c9, %c0_40, %c0_41] : memref<10x128x128xbf16, #tpu.memory_space<vmem>>, vector<1x128x128xbf16>
    %59 = vector.shape_cast %58 : vector<1x128x128xbf16> to vector<128x128xbf16>
    %cst_42 = arith.constant dense<0.000000e+00> : vector<8x128xf32>
    %60 = tpu.matmul %57, %59, %cst_42 {dimension_numbers = #tpu.dot_dimension_numbers<[1], [0], [0], [1], [0, 0, 1, 1], [], []>} : vector<8x128xbf16>, vector<128x128xbf16>, vector<8x128xf32> -> vector<8x128xf32>
    %61 = arith.addf %56, %60 : vector<8x128xf32>
    %c0_43 = arith.constant 0 : index
    %c0_44 = arith.constant 0 : index
    %62 = vector.load %arg6[%c0_43, %c0_44] : memref<8x128xf32, #tpu.memory_space<vmem>>, vector<8x128xf32>
    tpu.vector_store %arg6[%c0_43, %c0_44], %61 {strides = array<i32>} : memref<8x128xf32, #tpu.memory_space<vmem>>, vector<8x128xf32>,
    return
  }
}

</mosaic_0001>

<bundles_post_ra>
// kernel: multi_image_forward.1
= control target key start
LH: loop header
LB: loop body
LE: loop exit
PB: predicated region body
PF: predicated region fallthrough
CT: control target
= control target key end

     0   :  { %v2987_v0 = vmov 0   ;;  %vm2989_vm0 = vmmov 0   ;;  %vm740_vm1 = vcmask 523264   ;;  %s3712_s1 = inlined_call_operand.vmem [shape: bf16[256,128], index: 1, kind: input, shape index: {}]   ;;  %s3713_s0 = inlined_call_operand.vmem [shape: bf16[320,256], index: 0, kind: input, shape index: {}]   ;;  %s3714_s2 = inlined_call_operand.vmem [shape: bf16[80,320], index: 2, kind: input, shape index: {}]   ;;  %s3715_s3 = inlined_call_operand.vmem [shape: bf16[10,128,128], index: 3, kind: input, shape index: {}]   ;;  %s3716_s5 = inlined_call_operand.vmem [shape: bf16[128,128], index: 5, kind: input, shape index: {}]   ;;  %s3717_s4 = inlined_call_operand.vmem [shape: bf16[8,128], index: 4, kind: input, shape index: {}]   ;;  %s3718_s6 = inlined_call_operand.vmem [shape: f32[8,128], index: 6, kind: output, shape index: {}]  }
   0x1   :  { %392 = vmatprep.subr.bf16.mxu0 %v2987_v0  ;;  %v2803_v1 = vld [vmem:[%s3712_s1 + $0x38] sm:$0xff]   ;;  %v2804_v2 = vld [vmem:[%s3712_s1 + $0x30] sm:$0xff]   ;;  %v2805_v3 = vld [vmem:[%s3712_s1 + $0x28] sm:$0xff]  }
   0x2   :  { %393 = vmatpush1.bf16.msra.mxu0 %v2803_v1  ;;  %v2806_v4 = vld [vmem:[%s3712_s1 + $0x20] sm:$0xff]   ;;  %v2807_v5 = vld [vmem:[%s3712_s1 + $0x18] sm:$0xff]   ;;  %v2808_v7 = vld [vmem:[%s3712_s1 + $0x10] sm:$0xff]  }
   0x3   :  { %394 = vmatprep.subr.bf16.mxu0 %v2987_v0  ;;  %v2821_v6 = vld [vmem:[%s3713_s0 + $0x4] ss:$8 sps:$4 sm:$0xff]   ;;  %v2811_v10 = vld [vmem:[%s3712_s1 + $0x78] sm:$0xff]   ;;  %v2812_v11 = vld [vmem:[%s3712_s1 + $0x70] sm:$0xff]  }
   0x4   :  { %424 = vmatprep.mubr.bf16.mxu0 %v2821_v6  ;;  %v2809_v8 = vld [vmem:[%s3712_s1 + $0x8] sm:$0xff]   ;;  %v2810_v9 = vld [vmem:[%s3712_s1] sm:$0xff]   ;;  %v2815_v14 = vld [vmem:[%s3712_s1 + $0x58] sm:$0xff]  }
   0x5   :  { %v2813_v12 = vld [vmem:[%s3712_s1 + $0x68] sm:$0xff]   ;;  %v2814_v13 = vld [vmem:[%s3712_s1 + $0x60] sm:$0xff]   ;;  %v2816_v15 = vld [vmem:[%s3712_s1 + $0x50] sm:$0xff]  }
   0x6   :  { %395 = vmatpush1.bf16.msra.mxu0 %v2804_v2  ;;  %v2817_v16 = vld [vmem:[%s3712_s1 + $0x48] sm:$0xff]   ;;  %v2818_v17 = vld [vmem:[%s3712_s1 + $0x40] sm:$0xff]   ;;  %v2822_v19 = vld [vmem:[%s3713_s0 + $0x14] ss:$8 sps:$4 sm:$0xff]  }
   0x7   :  { %396 = vmatprep.subr.bf16.mxu0 %v2987_v0  ;;  %v2819_v18 = vld [vmem:[%s3713_s0] ss:$8 sps:$4 sm:$0xff]   ;;  %v2824_v20 = vld [vmem:[%s3713_s0 + $0x10] ss:$8 sps:$4 sm:$0xff]   ;;  %v2825_v21 = vld [vmem:[%s3713_s0 + $0x24] ss:$8 sps:$4 sm:$0xff]  }
   0x8   :  { %v2827_v22 = vld [vmem:[%s3713_s0 + $0x20] ss:$8 sps:$4 sm:$0xff]   ;;  %v2828_v23 = vld [vmem:[%s3713_s0 + $0x34] ss:$8 sps:$4 sm:$0xff]   ;;  %v2830_v24 = vld [vmem:[%s3713_s0 + $0x30] ss:$8 sps:$4 sm:$0xff]  }
   0x9   :  { %v2831_v25 = vld [vmem:[%s3713_s0 + $0x44] ss:$8 sps:$4 sm:$0xff]   ;;  %v2833_v26 = vld [vmem:[%s3713_s0 + $0x40] ss:$8 sps:$4 sm:$0xff]   ;;  %v2834_v27 = vld [vmem:[%s3713_s0 + $0x54] ss:$8 sps:$4 sm:$0xff]  }
   0xa   :  { %397 = vmatpush1.bf16.msra.mxu0 %v2805_v3  ;;  %v2836_v28 = vld [vmem:[%s3713_s0 + $0x50] ss:$8 sps:$4 sm:$0xff]   ;;  %v2837_v29 = vld [vmem:[%s3713_s0 + $0x64] ss:$8 sps:$4 sm:$0xff]   ;;  %v2839_v30 = vld [vmem:[%s3713_s0 + $0x60] ss:$8 sps:$4 sm:$0xff]  }
   0xb   :  { %398 = vmatprep.subr.bf16.mxu0 %v2987_v0  ;;  %v2840_v31 = vld [vmem:[%s3713_s0 + $0x74] ss:$8 sps:$4 sm:$0xff]   ;;  %v2842_v32 = vld [vmem:[%s3713_s0 + $0x70] ss:$8 sps:$4 sm:$0xff]   ;;  %v2843_v33 = vld [vmem:[%s3713_s0 + $0x84] ss:$8 sps:$4 sm:$0xff]  }
   0xc   :  { %v2845_v34 = vld [vmem:[%s3713_s0 + $0x80] ss:$8 sps:$4 sm:$0xff]   ;;  %v2846_v35 = vld [vmem:[%s3713_s0 + $0x94] ss:$8 sps:$4 sm:$0xff]   ;;  %v2848_v36 = vld [vmem:[%s3713_s0 + $0x90] ss:$8 sps:$4 sm:$0xff]  }
   0xd   :  { %v2849_v37 = vld [vmem:[%s3713_s0 + $0xa4] ss:$8 sps:$4 sm:$0xff]   ;;  %v2851_v38 = vld [vmem:[%s3713_s0 + $0xa0] ss:$8 sps:$4 sm:$0xff]   ;;  %v2852_v39 = vld [vmem:[%s3713_s0 + $0xb4] ss:$8 sps:$4 sm:$0xff]  }
   0xe   :  { %399 = vmatpush1.bf16.msra.mxu0 %v2806_v4  ;;  %v2854_v40 = vld [vmem:[%s3713_s0 + $0xb0] ss:$8 sps:$4 sm:$0xff]   ;;  %v2855_v41 = vld [vmem:[%s3713_s0 + $0xc4] ss:$8 sps:$4 sm:$0xff]   ;;  %v2857_v42 = vld [vmem:[%s3713_s0 + $0xc0] ss:$8 sps:$4 sm:$0xff]  }
   0xf   :  { %400 = vmatprep.subr.bf16.mxu0 %v2987_v0  ;;  %v2858_v43 = vld [vmem:[%s3713_s0 + $0xd4] ss:$8 sps:$4 sm:$0xff]   ;;  %v2860_v44 = vld [vmem:[%s3713_s0 + $0xd0] ss:$8 sps:$4 sm:$0xff]   ;;  %v2861_v45 = vld [vmem:[%s3713_s0 + $0xe4] ss:$8 sps:$4 sm:$0xff]  }
  0x10   :  { %v2863_v46 = vld [vmem:[%s3713_s0 + $0xe0] ss:$8 sps:$4 sm:$0xff]   ;;  %v2864_v47 = vld [vmem:[%s3713_s0 + $0xf4] ss:$8 sps:$4 sm:$0xff]   ;;  %v2866_v48 = vld [vmem:[%s3713_s0 + $0xf0] ss:$8 sps:$4 sm:$0xff]  }
  0x11   :  { %v2867_v49 = vld [vmem:[%s3713_s0 + $0x104] ss:$8 sps:$4 sm:$0xff]   ;;  %v2869_v50 = vld [vmem:[%s3713_s0 + $0x100] ss:$8 sps:$4 sm:$0xff]   ;;  %v2870_v51 = vld [vmem:[%s3713_s0 + $0x114] ss:$8 sps:$4 sm:$0xff]  }
  0x12   :  { %401 = vmatpush1.bf16.msra.mxu0 %v2807_v5  ;;  %v2872_v52 = vld [vmem:[%s3713_s0 + $0x110] ss:$8 sps:$4 sm:$0xff]   ;;  %v2873_v53 = vld [vmem:[%s3713_s0 + $0x124] ss:$8 sps:$4 sm:$0xff]   ;;  %v2875_v54 = vld [vmem:[%s3713_s0 + $0x120] ss:$8 sps:$4 sm:$0xff]  }
  0x13   :  { %402 = vmatprep.subr.bf16.mxu0 %v2987_v0  ;;  %v2876_v55 = vld [vmem:[%s3713_s0 + $0x134] ss:$8 sps:$4 sm:$0xff]   ;;  %v2878_v56 = vld [vmem:[%s3713_s0 + $0x130] ss:$8 sps:$4 sm:$0xff]  }
  0x16   :  { %403 = vmatpush1.bf16.msra.mxu0 %v2808_v7 }
  0x17   :  { %404 = vmatprep.subr.bf16.mxu0 %v2987_v0 }
  0x1a   :  { %405 = vmatpush1.bf16.msra.mxu0 %v2809_v8 }
  0x1b   :  { %406 = vmatprep.subr.bf16.mxu0 %v2987_v0 }
  0x1e   :  { %407 = vmatpush1.bf16.msra.mxu0 %v2810_v9 }
  0x1f   :  { %408 = vmatprep.subr.bf16.mxu0 %v2987_v0 }
  0x22   :  { %409 = vmatpush2.bf16.msra.mxu0 %v2811_v10 }
  0x23   :  { %410 = vmatprep.subr.bf16.mxu0 %v2987_v0 }
  0x26   :  { %411 = vmatpush2.bf16.msra.mxu0 %v2812_v11 }
  0x27   :  { %412 = vmatprep.subr.bf16.mxu0 %v2987_v0 }
  0x2a   :  { %413 = vmatpush2.bf16.msra.mxu0 %v2813_v12 }
  0x2b   :  { %414 = vmatprep.subr.bf16.mxu0 %v2987_v0 }
  0x2e   :  { %415 = vmatpush2.bf16.msra.mxu0 %v2814_v13 }
  0x2f   :  { %416 = vmatprep.subr.bf16.mxu0 %v2987_v0 }
  0x32   :  { %417 = vmatpush2.bf16.msra.mxu0 %v2815_v14 }
  0x33   :  { %418 = vmatprep.subr.bf16.mxu0 %v2987_v0 }
  0x36   :  { %419 = vmatpush2.bf16.msra.mxu0 %v2816_v15 }
  0x37   :  { %420 = vmatprep.subr.bf16.mxu0 %v2987_v0 }
  0x3a   :  { %421 = vmatpush2.bf16.msra.mxu0 %v2817_v16 }
  0x3b   :  { %422 = vmatprep.subr.bf16.mxu0 %v2987_v0 }
  0x3e   :  { %423 = vmatpush2.bf16.msra.mxu0 %v2818_v17 }
  0x41   :  { %425 = vmatmul.mubr.bf16.vlgmr.msra.gmra.mxu0 %v2819_v18 }
  0x42   :  { %432 = vmatprep.mubr.bf16.mxu0 %v2822_v19 }
  0x49   :  { %433 = vmatmul.mubr.bf16.gmra.mxu0 %v2824_v20  ;;  %v2881_v20 = vld [vmem:[%s3714_s2 + $0x4] ss:$12 sps:$4 sm:$0xff]  }
  0x4a   :  { %440 = vmatprep.mubr.bf16.mxu0 %v2825_v21  ;;  %788 = vmatprep.mubr.bf16.mxu1 %v2881_v20 }
  0x51   :  { %441 = vmatmul.mubr.bf16.gmra.mxu0 %v2827_v22 }
  0x52   :  { %448 = vmatprep.mubr.bf16.mxu0 %v2828_v23  ;;  %v2988_v23 = vmov 0.0  }
  0x53   :  { %2660 = vmatprep.subr.bf16.mxu0 %v2988_v23 }
  0x59   :  { %449 = vmatmul.mubr.bf16.gmra.mxu0 %v2830_v24 }
  0x5a   :  { %456 = vmatprep.mubr.bf16.mxu0 %v2831_v25 }
  0x61   :  { %457 = vmatmul.mubr.bf16.gmra.mxu0 %v2833_v26 }
  0x62   :  { %464 = vmatprep.mubr.bf16.mxu0 %v2834_v27 }
  0x69   :  { %465 = vmatmul.mubr.bf16.gmra.mxu0 %v2836_v28 }
  0x6a   :  { %472 = vmatprep.mubr.bf16.mxu0 %v2837_v29 }
  0x71   :  { %473 = vmatmul.mubr.bf16.gmra.mxu0 %v2839_v30 }
  0x72   :  { %480 = vmatprep.mubr.bf16.mxu0 %v2840_v31 }
  0x79   :  { %481 = vmatmul.mubr.bf16.gmra.mxu0 %v2842_v32 }
  0x7a   :  { %488 = vmatprep.mubr.bf16.mxu0 %v2843_v33 }
  0x81   :  { %489 = vmatmul.mubr.bf16.gmra.mxu0 %v2845_v34 }
  0x82   :  { %496 = vmatprep.mubr.bf16.mxu0 %v2846_v35 }
  0x89   :  { %497 = vmatmul.mubr.bf16.gmra.mxu0 %v2848_v36 }
  0x8a   :  { %504 = vmatprep.mubr.bf16.mxu0 %v2849_v37 }
  0x91   :  { %505 = vmatmul.mubr.bf16.gmra.mxu0 %v2851_v38 }
  0x92   :  { %512 = vmatprep.mubr.bf16.mxu0 %v2852_v39 }
  0x99   :  { %513 = vmatmul.mubr.bf16.gmra.mxu0 %v2854_v40 }
  0x9a   :  { %520 = vmatprep.mubr.bf16.mxu0 %v2855_v41 }
  0xa1   :  { %521 = vmatmul.mubr.bf16.gmra.mxu0 %v2857_v42 }
  0xa2   :  { %528 = vmatprep.mubr.bf16.mxu0 %v2858_v43 }
  0xa9   :  { %529 = vmatmul.mubr.bf16.gmra.mxu0 %v2860_v44 }
  0xaa   :  { %536 = vmatprep.mubr.bf16.mxu0 %v2861_v45 }
  0xb1   :  { %537 = vmatmul.mubr.bf16.gmra.mxu0 %v2863_v46 }
  0xb2   :  { %544 = vmatprep.mubr.bf16.mxu0 %v2864_v47 }
  0xb9   :  { %545 = vmatmul.mubr.bf16.gmra.mxu0 %v2866_v48 }
  0xba   :  { %552 = vmatprep.mubr.bf16.mxu0 %v2867_v49 }
  0xc1   :  { %553 = vmatmul.mubr.bf16.gmra.mxu0 %v2869_v50 }
  0xc2   :  { %560 = vmatprep.mubr.bf16.mxu0 %v2870_v51 }
  0xc9   :  { %561 = vmatmul.mubr.bf16.gmra.mxu0 %v2872_v52 }
  0xca   :  { %568 = vmatprep.mubr.bf16.mxu0 %v2873_v53 }
  0xd1   :  { %569 = vmatmul.mubr.bf16.gmra.mxu0 %v2875_v54 }
  0xd2   :  { %576 = vmatprep.mubr.bf16.mxu0 %v2876_v55 }
  0xd9   :  { %577 = vmatmul.mubr.bf16.gmra.mxu0 %v2878_v56 }
  0xda   :  { %2676 = vmatprep.mubr.msk.bf16.mxu0 %vm2989_vm0, %v2988_v23 }
 0x101   :  { %v426_v57 = vpop.f32.mrf.mxu0 }
 0x102   :  { %v585_v60 = vmax.f32 %v426_v57, 0.0 }
 0x103   :  { %v428_v58 = vpop.f32.mrf.mxu0 }
 0x105   :  { %v429_v59 = vpop.f32.mrf.mxu0 }
 0x106   :  { %v586_v61 = vmax.f32 %v429_v59, 0.0 }
 0x107   :  { %v431_v62 = vpop.f32.mrf.mxu0 }
 0x108   :  { %v3193_v63 = vpack.c.bf16 %v586_v61, %v585_v60 }
 0x109   :  { %v434_v0 = vpop.f32.mrf.mxu0 }
 0x10a   :  { %v587_v3 = vmax.f32 %v434_v0, 0.0 }
 0x10b   :  { %v436_v1 = vpop.f32.mrf.mxu0 }
 0x10d   :  { %v437_v2 = vpop.f32.mrf.mxu0 }
 0x10e   :  { %v588_v4 = vmax.f32 %v437_v2, 0.0 }
 0x10f   :  { %v439_v5 = vpop.f32.mrf.mxu0 }
 0x110   :  { %v3195_v6 = vpack.c.bf16 %v588_v4, %v587_v3 }
 0x111   :  { %v442_v7 = vpop.f32.mrf.mxu0 }
 0x112   :  { %v589_v10 = vmax.f32 %v442_v7, 0.0 }
 0x113   :  { %v444_v8 = vpop.f32.mrf.mxu0 }
 0x115   :  { %v445_v9 = vpop.f32.mrf.mxu0 }
 0x116   :  { %v590_v11 = vmax.f32 %v445_v9, 0.0 }
 0x117   :  { %v447_v12 = vpop.f32.mrf.mxu0 }
 0x118   :  { %v3197_v13 = vpack.c.bf16 %v590_v11, %v589_v10 }
 0x119   :  { %v450_v14 = vpop.f32.mrf.mxu0 }
 0x11a   :  { %v591_v17 = vmax.f32 %v450_v14, 0.0 }
 0x11b   :  { %v452_v15 = vpop.f32.mrf.mxu0 }
 0x11d   :  { %v453_v16 = vpop.f32.mrf.mxu0 }
 0x11e   :  { %v592_v18 = vmax.f32 %v453_v16, 0.0 }
 0x11f   :  { %v455_v19 = vpop.f32.mrf.mxu0 }
 0x120   :  { %v3202_v21 = vpack.c.bf16 %v592_v18, %v591_v17  ;;  %v2899_v18 = vld [vmem:[%s3715_s3 + $0xf8] sm:$0xff]  }
 0x121   :  { %v458_v22 = vpop.f32.mrf.mxu0  ;;  %2661 = vmatpush3.bf16.msra.mxu0 %v2899_v18  ;;  %v2890_v18 = vld [vmem:[%s3714_s2 + $0x48] ss:$12 sps:$4 sm:$0xff]  }
 0x122   :  { %v593_v26 = vmax.f32 %v458_v22, 0.0  ;;  %2662 = vmatprep.subr.bf16.mxu0 %v2988_v23 }
 0x123   :  { %v460_v24 = vpop.f32.mrf.mxu0 }
 0x125   :  { %v461_v25 = vpop.f32.mrf.mxu0 }
 0x126   :  { %v594_v27 = vmax.f32 %v461_v25, 0.0 }
 0x127   :  { %v463_v28 = vpop.f32.mrf.mxu0 }
 0x128   :  { %v3205_v29 = vpack.c.bf16 %v594_v27, %v593_v26 }
 0x129   :  { %v466_v30 = vpop.f32.mrf.mxu0 }
 0x12a   :  { %v595_v33 = vmax.f32 %v466_v30, 0.0 }
 0x12b   :  { %v468_v31 = vpop.f32.mrf.mxu0 }
 0x12d   :  { %v469_v32 = vpop.f32.mrf.mxu0 }
 0x12e   :  { %v596_v34 = vmax.f32 %v469_v32, 0.0 }
 0x12f   :  { %v471_v35 = vpop.f32.mrf.mxu0 }
 0x130   :  { %v3207_v36 = vpack.c.bf16 %v596_v34, %v595_v33 }
 0x131   :  { %v474_v37 = vpop.f32.mrf.mxu0 }
 0x132   :  { %v597_v40 = vmax.f32 %v474_v37, 0.0 }
 0x133   :  { %v476_v38 = vpop.f32.mrf.mxu0 }
 0x135   :  { %v477_v39 = vpop.f32.mrf.mxu0 }
 0x136   :  { %v598_v41 = vmax.f32 %v477_v39, 0.0 }
 0x137   :  { %v479_v42 = vpop.f32.mrf.mxu0 }
 0x138   :  { %v3209_v43 = vpack.c.bf16 %v598_v41, %v597_v40 }
 0x139   :  { %v482_v44 = vpop.f32.mrf.mxu0 }
 0x13a   :  { %v599_v47 = vmax.f32 %v482_v44, 0.0 }
 0x13b   :  { %v484_v45 = vpop.f32.mrf.mxu0 }
 0x13d   :  { %v485_v46 = vpop.f32.mrf.mxu0 }
 0x13e   :  { %v600_v48 = vmax.f32 %v485_v46, 0.0 }
 0x13f   :  { %v487_v49 = vpop.f32.mrf.mxu0 }
 0x140   :  { %v632_v50 = vpack.c.bf16 %v600_v48, %v599_v47 }
 0x141   :  { %v490_v51 = vpop.f32.mrf.mxu0 }
 0x142   :  { %v601_v54 = vmax.f32 %v490_v51, 0.0 }
 0x143   :  { %v492_v52 = vpop.f32.mrf.mxu0 }
 0x145   :  { %v493_v53 = vpop.f32.mrf.mxu0 }
 0x146   :  { %v602_v55 = vmax.f32 %v493_v53, 0.0 }
 0x147   :  { %v495_v56 = vpop.f32.mrf.mxu0 }
 0x148   :  { %v3213_v57 = vpack.c.bf16 %v602_v55, %v601_v54 }
 0x149   :  { %v498_v58 = vpop.f32.mrf.mxu0 }
 0x14a   :  { %v603_v61 = vmax.f32 %v498_v58, 0.0 }
 0x14b   :  { %v500_v59 = vpop.f32.mrf.mxu0 }
 0x14d   :  { %v501_v60 = vpop.f32.mrf.mxu0 }
 0x14e   :  { %v604_v62 = vmax.f32 %v501_v60, 0.0 }
 0x14f   :  { %v503_v0 = vpop.f32.mrf.mxu0 }
 0x150   :  { %v3215_v1 = vpack.c.bf16 %v604_v62, %v603_v61 }
 0x151   :  { %v3217_v2 = vpop.f32.mrf.mxu0 }
 0x153   :  { %v508_v3 = vpop.f32.mrf.mxu0 }
 0x155   :  { %v509_v4 = vpop.f32.mrf.mxu0 }
 0x156   :  { %v606_v56 = vmax.f32 %v509_v4, 0.0 }
 0x157   :  { %v511_v5 = vpop.f32.mrf.mxu0 }
 0x158   :  { %v2882_v5 = vld [vmem:[%s3714_s2 + $0x1c] ss:$12 sps:$4 sm:$0xff]  }
 0x159   :  { %v514_v7 = vpop.f32.mrf.mxu0 }
 0x15a   :  { %v607_v51 = vmax.f32 %v514_v7, 0.0 }
 0x15b   :  { %v516_v8 = vpop.f32.mrf.mxu0 }
 0x15d   :  { %v517_v9 = vpop.f32.mrf.mxu0 }
 0x15e   :  { %v608_v52 = vmax.f32 %v517_v9, 0.0 }
 0x15f   :  { %v519_v10 = vpop.f32.mrf.mxu0 }
 0x160   :  { %v636_v58 = vpack.c.bf16 %v608_v52, %v607_v51  ;;  %v2884_v10 = vld [vmem:[%s3714_s2 + $0x18] ss:$12 sps:$4 sm:$0xff]  }
 0x161   :  { %v522_v11 = vpop.f32.mrf.mxu0 }
 0x162   :  { %v609_v45 = vmax.f32 %v522_v11, 0.0 }
 0x163   :  { %v524_v12 = vpop.f32.mrf.mxu0 }
 0x165   :  { %v525_v14 = vpop.f32.mrf.mxu0 }
 0x166   :  { %v610_v46 = vmax.f32 %v525_v14, 0.0 }
 0x167   :  { %v527_v15 = vpop.f32.mrf.mxu0 }
 0x168   :  { %v637_v53 = vpack.c.bf16 %v610_v46, %v609_v45  ;;  %v2916_v45 = vld [vmem:[%s3715_s3 + $0xc0] sm:$0xff]  }
 0x169   :  { %v530_v16 = vpop.f32.mrf.mxu0 }
 0x16a   :  { %v611_v39 = vmax.f32 %v530_v16, 0.0  ;;  %v2887_v16 = vld [vmem:[%s3714_s2 + $0x30] ss:$12 sps:$4 sm:$0xff]  }
 0x16b   :  { %v532_v17 = vpop.f32.mrf.mxu0 }
 0x16c   :  { %v2888_v17 = vld [vmem:[%s3714_s2 + $0x4c] ss:$12 sps:$4 sm:$0xff]  }
 0x16d   :  { %v533_v19 = vpop.f32.mrf.mxu0 }
 0x16e   :  { %v612_v40 = vmax.f32 %v533_v19, 0.0  ;;  %v2891_v19 = vld [vmem:[%s3714_s2 + $0x64] ss:$12 sps:$4 sm:$0xff]  }
 0x16f   :  { %v535_v20 = vpop.f32.mrf.mxu0 }
 0x170   :  { %v638_v47 = vpack.c.bf16 %v612_v40, %v611_v39  ;;  %v2893_v20 = vld [vmem:[%s3714_s2 + $0x60] ss:$12 sps:$4 sm:$0xff]   ;;  %v2910_v40 = vld [vmem:[%s3715_s3 + $0xd8] sm:$0xff]  }
 0x171   :  { %v538_v22 = vpop.f32.mrf.mxu0  ;;  %v2909_v39 = vld [vmem:[%s3715_s3 + $0x8] sm:$0xff]  }
 0x172   :  { %v613_v28 = vmax.f32 %v538_v22, 0.0  ;;  %v2894_v22 = vld [vmem:[%s3714_s2 + $0x8] ss:$12 sps:$4 sm:$0xff]  }
 0x173   :  { %v540_v24 = vpop.f32.mrf.mxu0 }
 0x174   :  { %v2895_v24 = vld [vmem:[%s3714_s2 + $0x20] ss:$12 sps:$4 sm:$0xff]  }
 0x175   :  { %v541_v25 = vpop.f32.mrf.mxu0 }
 0x176   :  { %v614_v30 = vmax.f32 %v541_v25, 0.0  ;;  %v2896_v25 = vld [vmem:[%s3714_s2 + $0x38] ss:$12 sps:$4 sm:$0xff]  }
 0x177   :  { %v543_v26 = vpop.f32.mrf.mxu0 }
 0x178   :  { %v639_v41 = vpack.c.bf16 %v614_v30, %v613_v28  ;;  %v2897_v26 = vld [vmem:[%s3714_s2 + $0x50] ss:$12 sps:$4 sm:$0xff]  }
 0x179   :  { %v546_v27 = vpop.f32.mrf.mxu0  ;;  %v2900_v28 = vld [vmem:[%s3715_s3 + $0xf0] sm:$0xff]   ;;  %v2901_v30 = vld [vmem:[%s3715_s3 + $0x38] sm:$0xff]  }
 0x17a   :  { %v615_v33 = vmax.f32 %v546_v27, 0.0  ;;  %v2898_v27 = vld [vmem:[%s3714_s2 + $0x68] ss:$12 sps:$4 sm:$0xff]   ;;  %2663 = vmatpush3.bf16.msra.mxu0 %v2900_v28 }
 0x17b   :  { %v548_v31 = vpop.f32.mrf.mxu0  ;;  %2664 = vmatprep.subr.bf16.mxu0 %v2988_v23 }
 0x17c   :  { %v2902_v31 = vld [vmem:[%s3715_s3 + $0x30] sm:$0xff]  }
 0x17d   :  { %v549_v32 = vpop.f32.mrf.mxu0 }
 0x17e   :  { %v616_v34 = vmax.f32 %v549_v32, 0.0  ;;  %v2903_v32 = vld [vmem:[%s3715_s3 + $0x28] sm:$0xff]  }
 0x17f   :  { %v551_v35 = vpop.f32.mrf.mxu0 }
 0x180   :  { %v640_v37 = vpack.c.bf16 %v616_v34, %v615_v33  ;;  %v2904_v33 = vld [vmem:[%s3715_s3 + $0x20] sm:$0xff]   ;;  %v2905_v34 = vld [vmem:[%s3715_s3 + $0xe8] sm:$0xff]   ;;  %v2906_v35 = vld [vmem:[%s3715_s3 + $0x18] sm:$0xff]  }
 0x181   :  { %v3223_v38 = vpop.f32.mrf.mxu0  ;;  %2665 = vmatpush3.bf16.msra.mxu0 %v2905_v34 }
 0x182   :  { %2398 = vmatprep.subr.bf16.mxu1 %v640_v37  ;;  %v617_v11 = vmax.f32 %v3223_v38, 0.0  ;;  %2666 = vmatprep.subr.bf16.mxu0 %v2988_v23  ;;  %v2907_v37 = vld [vmem:[%s3715_s3 + $0x10] sm:$0xff]   ;;  %v2908_v38 = vld [vmem:[%s3715_s3 + $0xe0] sm:$0xff]  }
 0x183   :  { %v556_v42 = vpop.f32.mrf.mxu0  ;;  %2399 = vmatpush3.bf16.msra.mxu1 %v632_v50  ;;  %v605_v50 = vmax.f32 %v3217_v2, 0.0 }
 0x184   :  { %2400 = vmatprep.subr.bf16.mxu1 %v639_v41  ;;  %v2911_v41 = vld [vmem:[%s3715_s3] sm:$0xff]   ;;  %v2912_v42 = vld [vmem:[%s3715_s3 + $0xd0] sm:$0xff]  }
 0x185   :  { %v3225_v44 = vpop.f32.mrf.mxu0  ;;  %2667 = vmatpush3.bf16.msra.mxu0 %v2908_v38  ;;  %v2922_v38 = vld [vmem:[%s3715_s3 + $0x168] sm:$0xff]  }
 0x186   :  { %v618_v12 = vmax.f32 %v3225_v44, 0.0  ;;  %2668 = vmatprep.subr.bf16.mxu0 %v2988_v23  ;;  %v2914_v44 = vld [vmem:[%s3715_s3 + $0xc8] sm:$0xff]  }
 0x187   :  { %v559_v48 = vpop.f32.mrf.mxu0  ;;  %2401 = vmatpush3.bf16.msra.mxu1 %v3209_v43  ;;  %v635_v43 = vpack.c.bf16 %v606_v56, %v605_v50 }
 0x188   :  { %2402 = vmatprep.subr.bf16.mxu1 %v638_v47  ;;  %v641_v15 = vpack.c.bf16 %v618_v12, %v617_v11 }
 0x189   :  { %v562_v49 = vpop.f32.mrf.mxu0  ;;  %2669 = vmatpush3.bf16.msra.mxu0 %v2910_v40  ;;  %v2923_v40 = vld [vmem:[%s3716_s5 + $0x10] sm:$0xff]  }
 0x18a   :  { %2670 = vmatprep.subr.bf16.mxu0 %v2988_v23 }
 0x18b   :  { %v564_v54 = vpop.f32.mrf.mxu0  ;;  %2403 = vmatpush3.bf16.msra.mxu1 %v3207_v36 }
 0x18c   :  { %2404 = vmatprep.subr.bf16.mxu1 %v637_v53 }
 0x18d   :  { %v565_v55 = vpop.f32.mrf.mxu0  ;;  %2671 = vmatpush3.bf16.msra.mxu0 %v2912_v42  ;;  %v2924_v42 = vld [vmem:[%s3715_s3 + $0x160] sm:$0xff]  }
 0x18e   :  { %v620_v9 = vmax.f32 %v565_v55, 0.0  ;;  %2672 = vmatprep.subr.bf16.mxu0 %v2988_v23 }
 0x18f   :  { %v567_v59 = vpop.f32.mrf.mxu0  ;;  %2405 = vmatpush3.bf16.msra.mxu1 %v3205_v29  ;;  %v2879_v29 = vld [vmem:[%s3714_s2] ss:$12 sps:$4 sm:$0xff]  }
 0x190   :  { %2406 = vmatprep.subr.bf16.mxu1 %v636_v58 }
 0x191   :  { %v570_v60 = vpop.f32.mrf.mxu0  ;;  %2673 = vmatpush3.bf16.msra.mxu0 %v2914_v44 }
 0x192   :  { %v621_v2 = vmax.f32 %v570_v60, 0.0  ;;  %2674 = vmatprep.subr.bf16.mxu0 %v2988_v23 }
 0x193   :  { %v572_v61 = vpop.f32.mrf.mxu0  ;;  %2407 = vmatpush3.bf16.msra.mxu1 %v3202_v21 }
 0x194   :  { %2408 = vmatprep.subr.bf16.mxu1 %v635_v43 }
 0x195   :  { %v573_v62 = vpop.f32.mrf.mxu0  ;;  %2675 = vmatpush3.bf16.msra.mxu0 %v2916_v45 }
 0x196   :  { %2700 = vmatprep.subr.bf16.mxu0 %v2988_v23 }
 0x197   :  { %v575_v0 = vpop.f32.mrf.mxu0  ;;  %2409 = vmatpush3.bf16.msra.mxu1 %v3197_v13  ;;  %v622_v13 = vmax.f32 %v573_v62, 0.0 }
 0x198   :  { %2410 = vmatprep.subr.bf16.mxu1 %v3215_v1 }
 0x199   :  { %v578_v36 = vpop.f32.mrf.mxu0 }
 0x19a   :  { %v623_v3 = vmax.f32 %v578_v36, 0.0 }
 0x19b   :  { %v580_v4 = vpop.f32.mrf.mxu0  ;;  %2411 = vmatpush3.bf16.msra.mxu1 %v3195_v6  ;;  %v643_v6 = vpack.c.bf16 %v622_v13, %v621_v2 }
 0x19c   :  { %2412 = vmatprep.subr.bf16.mxu1 %v3213_v57  ;;  %v619_v57 = vmax.f32 %v562_v49, 0.0 }
 0x19d   :  { %v581_v21 = vpop.f32.mrf.mxu0 }
 0x19e   :  { %v624_v7 = vmax.f32 %v581_v21, 0.0  ;;  %v642_v14 = vpack.c.bf16 %v620_v9, %v619_v57 }
 0x19f   :  { %v583_v1 = vpop.f32.mrf.mxu0  ;;  %2413 = vmatpush3.bf16.msra.mxu1 %v3193_v63  ;;  %v2885_v63 = vld [vmem:[%s3714_s2 + $0x34] ss:$12 sps:$4 sm:$0xff]  }
 0x1a0   :  { %v644_v8 = vpack.c.bf16 %v624_v7, %v623_v3  ;;  %2552 = vmatprep.subr.bf16.mxu1 %v2988_v23 }
 0x1a2   :  { %789 = vmatmul.mubr.bf16.vlgmr.msra.gmra.mxu1 %v2879_v29 }
 0x1a3   :  { %2553 = vmatpush3.bf16.msra.mxu1 %v644_v8  ;;  %796 = vmatprep.mubr.bf16.mxu1 %v2882_v5 }
 0x1a4   :  { %2554 = vmatprep.subr.bf16.mxu1 %v2988_v23 }
 0x1a7   :  { %2555 = vmatpush3.bf16.msra.mxu1 %v643_v6 }
 0x1a8   :  { %2556 = vmatprep.subr.bf16.mxu1 %v2988_v23 }
 0x1aa   :  { %797 = vmatmul.mubr.bf16.gmra.mxu1 %v2884_v10 }
 0x1ab   :  { %2557 = vmatpush3.bf16.msra.mxu1 %v642_v14  ;;  %804 = vmatprep.mubr.bf16.mxu1 %v2885_v63  ;;  %v2913_v63 = vld [vmem:[%s3716_s5 + $0x38] sm:$0xff]  }
 0x1ac   :  { %2558 = vmatprep.subr.bf16.mxu1 %v2988_v23 }
 0x1af   :  { %2559 = vmatpush3.bf16.msra.mxu1 %v641_v15  ;;  %v2915_v15 = vld [vmem:[%s3716_s5 + $0x30] sm:$0xff]  }
 0x1b0   :  { %2580 = vmatprep.subr.bf16.mxu1 %v2988_v23 }
 0x1b2   :  { %805 = vmatmul.mubr.bf16.gmra.mxu1 %v2887_v16 }
 0x1b3   :  { %812 = vmatprep.mubr.bf16.mxu1 %v2888_v17 }
 0x1ba   :  { %813 = vmatmul.mubr.bf16.gmra.mxu1 %v2890_v18 }
 0x1bb   :  { %820 = vmatprep.mubr.bf16.mxu1 %v2891_v19 }
 0x1c2   :  { %821 = vmatmul.mubr.bf16.gmra.mxu1 %v2893_v20 }
 0x1c3   :  { %2560 = vmatprep.mubr.msk.bf16.mxu1 %vm2989_vm0, %v2988_v23 }
 0x1ca   :  { %2561 = vmatmul.mubr.msk.bf16.vlgmr.msra.gmra.mxu1 %vm740_vm1, %v2894_v22 }
 0x1cb   :  { %2564 = vmatprep.mubr.msk.bf16.mxu1 %vm2989_vm0, %v2988_v23  ;;  %2581 = vmatpush3.bf16.msra.mxu1 %v2901_v30 }
 0x1cc   :  { %2582 = vmatprep.subr.bf16.mxu1 %v2988_v23 }
 0x1cf   :  { %2583 = vmatpush3.bf16.msra.mxu1 %v2902_v31  ;;  %v2919_v31 = vld [vmem:[%s3716_s5 + $0x20] sm:$0xff]  }
 0x1d0   :  { %2584 = vmatprep.subr.bf16.mxu1 %v2988_v23 }
 0x1d2   :  { %2565 = vmatmul.mubr.msk.bf16.gmra.mxu1 %vm740_vm1, %v2895_v24  ;;  %v2917_v24 = vld [vmem:[%s3716_s5 + $0x28] sm:$0xff]  }
 0x1d3   :  { %2568 = vmatprep.mubr.msk.bf16.mxu1 %vm2989_vm0, %v2988_v23  ;;  %2585 = vmatpush3.bf16.msra.mxu1 %v2903_v32 }
 0x1d4   :  { %2586 = vmatprep.subr.bf16.mxu1 %v2988_v23 }
 0x1d7   :  { %2587 = vmatpush3.bf16.msra.mxu1 %v2904_v33  ;;  %v2920_v33 = vld [vmem:[%s3715_s3 + $0x170] sm:$0xff]  }
 0x1d8   :  { %2588 = vmatprep.subr.bf16.mxu1 %v2988_v23 }
 0x1da   :  { %2569 = vmatmul.mubr.msk.bf16.gmra.mxu1 %vm740_vm1, %v2896_v25 }
 0x1db   :  { %2572 = vmatprep.mubr.msk.bf16.mxu1 %vm2989_vm0, %v2988_v23  ;;  %2589 = vmatpush3.bf16.msra.mxu1 %v2906_v35  ;;  %v2921_v35 = vld [vmem:[%s3716_s5 + $0x18] sm:$0xff]  }
 0x1dc   :  { %2590 = vmatprep.subr.bf16.mxu1 %v2988_v23 }
 0x1df   :  { %2591 = vmatpush3.bf16.msra.mxu1 %v2907_v37 }
 0x1e0   :  { %2592 = vmatprep.subr.bf16.mxu1 %v2988_v23 }
 0x1e2   :  { %2573 = vmatmul.mubr.msk.bf16.gmra.mxu1 %vm740_vm1, %v2897_v26 }
 0x1e3   :  { %2576 = vmatprep.mubr.msk.bf16.mxu1 %vm2989_vm0, %v2988_v23  ;;  %2593 = vmatpush3.bf16.msra.mxu1 %v2909_v39 }
 0x1e4   :  { %2594 = vmatprep.subr.bf16.mxu1 %v2988_v23 }
 0x1e7   :  { %2595 = vmatpush3.bf16.msra.mxu1 %v2911_v41 }
 0x1e8   :  { %2600 = vmatprep.subr.bf16.mxu1 %v2988_v23 }
 0x1ea   :  { %2577 = vmatmul.mubr.msk.bf16.gmra.mxu1 %vm740_vm1, %v2898_v27  ;;  %v2918_v27 = vld [vmem:[%s3715_s3 + $0x178] sm:$0xff]  }
 0x1eb   :  { %2596 = vmatprep.mubr.msk.bf16.mxu1 %vm2989_vm0, %v2988_v23 }
 0x262   :  { %v2414_v46 = vpop.f32.mrf.mxu1 }
 0x264   :  { %v2415_v47 = vpop.f32.mrf.mxu1 }
 0x265   :  { %v2416_v1 = vadd.f32 %v2415_v47, %v2414_v46  ;;  %v2925_v47 = vld [vmem:[%s3716_s5 + $0x8] sm:$0xff]  }
 0x266   :  { %v2417_v48 = vpop.f32.mrf.mxu1 }
 0x268   :  { %v2418_v49 = vpop.f32.mrf.mxu1 }
 0x269   :  { %v2419_v8 = vadd.f32 %v2418_v49, %v2417_v48 }
 0x26a   :  { %v2420_v51 = vpop.f32.mrf.mxu1 }
 0x26c   :  { %v2421_v52 = vpop.f32.mrf.mxu1 }
 0x26d   :  { %v2422_v16 = vadd.f32 %v2421_v52, %v2420_v51  ;;  %v2926_v51 = vld [vmem:[%s3715_s3 + $0x158] sm:$0xff]  }
 0x26e   :  { %v2423_v53 = vpop.f32.mrf.mxu1 }
 0x270   :  { %v2424_v54 = vpop.f32.mrf.mxu1 }
 0x271   :  { %v2425_v17 = vadd.f32 %v2424_v54, %v2423_v53  ;;  %v2927_v54 = vld [vmem:[%s3716_s5] sm:$0xff]  }
 0x272   :  { %v2426_v55 = vpop.f32.mrf.mxu1 }
 0x274   :  { %v2427_v50 = vpop.f32.mrf.mxu1 }
 0x275   :  { %v3358_v56 = vadd.f32 %v2427_v50, %v2426_v55  ;;  %v2928_v50 = vld [vmem:[%s3715_s3 + $0x150] sm:$0xff]  }
 0x276   :  { %v3360_v58 = vpop.f32.mrf.mxu1 }
 0x278   :  { %v3362_v59 = vpop.f32.mrf.mxu1 }
 0x27a   :  { %v2432_v60 = vpop.f32.mrf.mxu1 }
 0x27c   :  { %v2433_v43 = vpop.f32.mrf.mxu1 }
 0x27d   :  { %v3364_v61 = vadd.f32 %v2433_v43, %v2432_v60  ;;  %v907_v43 = vld [vmem:[%s3717_s4] sm:$0xf] }
 0x27e   :  { %v2435_v62 = vpop.f32.mrf.mxu1 }
 0x280   :  { %v2436_v0 = vpop.f32.mrf.mxu1 }
 0x281   :  { %v3366_v36 = vadd.f32 %v2436_v0, %v2435_v62  ;;  %v2431_v0 = vadd.f32 %v3362_v59, %v3360_v58  ;;  %v2932_v59 = vld [vmem:[%s3715_s3 + $0x140] sm:$0xff]  }
 0x282   :  { %v2438_v2 = vpop.f32.mrf.mxu1 }
 0x284   :  { %v2439_v3 = vpop.f32.mrf.mxu1 }
 0x285   :  { %v3368_v4 = vadd.f32 %v2439_v3, %v2438_v2  ;;  %v2930_v2 = vld [vmem:[%s3715_s3 + $0x148] sm:$0xff]  }
 0x286   :  { %v2441_v29 = vpop.f32.mrf.mxu1 }
 0x288   :  { %v2442_v21 = vpop.f32.mrf.mxu1 }
 0x289   :  { %v3370_v5 = vadd.f32 %v2442_v21, %v2441_v29  ;;  %v2933_v21 = vld [vmem:[%s3715_s3 + $0x68] sm:$0xff]  }
 0x28a   :  { %v863_v13 = vpop.f32.mrf.mxu1 }
 0x28b   :  { %v864_v57 = vadd.f32 %v2416_v1, %v863_v13  ;;  %v2935_v13 = vld [vmem:[%s3715_s3 + $0x60] sm:$0xff]   ;;  %v2937_v1 = vld [vmem:[%s3715_s3 + $0x58] sm:$0xff]  }
 0x28c   :  { %v2562_v7 = vpop.f32.mrf.mxu1 }
 0x28d   :  { %v2936_v7 = vld [vmem:[%s3715_s3 + $0x1f0] sm:$0xff]  }
 0x28e   :  { %v866_v6 = vpop.f32.mrf.mxu1 }
 0x28f   :  { %v867_v9 = vadd.f32 %v2419_v8, %v866_v6  ;;  %v2938_v8 = vld [vmem:[%s3715_s3 + $0x1e8] sm:$0xff]   ;;  %v2939_v6 = vld [vmem:[%s3715_s3 + $0x50] sm:$0xff]  }
 0x290   :  { %v2563_v10 = vpop.f32.mrf.mxu1 }
 0x291   :  { %v3375_v11 = vpack.c.bf16 %v867_v9, %v864_v57  ;;  %v2940_v57 = vld [vmem:[%s3715_s3 + $0x1e0] sm:$0xff]   ;;  %v2941_v9 = vld [vmem:[%s3715_s3 + $0x48] sm:$0xff]   ;;  %v2942_v10 = vld [vmem:[%s3715_s3 + $0x1d8] sm:$0xff]  }
 0x292   :  { %v871_v12 = vpop.f32.mrf.mxu1 }
 0x293   :  { %2597 = vmatmul.mubr.bf16.vlgmr.msra.gmra.mxu1 %v3375_v11  ;;  %v872_v19 = vadd.f32 %v2422_v16, %v871_v12  ;;  %v2944_v12 = vld [vmem:[%s3715_s3 + $0x1d0] sm:$0xff]   ;;  %v2946_v16 = vld [vmem:[%s3715_s3 + $0x1c8] sm:$0xff]  }
 0x294   :  { %2601 = vmatpush3.bf16.msra.mxu1 %v2913_v63  ;;  %v2566_v14 = vpop.f32.mrf.mxu1  ;;  %2616 = vmatprep.mubr.msk.bf16.mxu1 %vm2989_vm0, %v2988_v23  ;;  %v2943_v63 = vld [vmem:[%s3715_s3 + $0x40] sm:$0xff]  }
 0x295   :  { %2602 = vmatprep.subr.bf16.mxu1 %v2988_v23  ;;  %v2945_v14 = vld [vmem:[%s3715_s3 + $0xb8] sm:$0xff]  }
 0x296   :  { %v874_v18 = vpop.f32.mrf.mxu1 }
 0x297   :  { %v875_v20 = vadd.f32 %v2425_v17, %v874_v18  ;;  %v2947_v17 = vld [vmem:[%s3715_s3 + $0xb0] sm:$0xff]   ;;  %v2949_v18 = vld [vmem:[%s3715_s3 + $0xa8] sm:$0xff]  }
 0x298   :  { %2603 = vmatpush3.bf16.msra.mxu1 %v2915_v15  ;;  %v2567_v22 = vpop.f32.mrf.mxu1  ;;  %v1134_v15 = vrot.slane %v3375_v11, 4  ;;  %v2948_v11 = vld [vmem:[%s3715_s3 + $0x1c0] sm:$0xff]  }
 0x299   :  { %v3387_v25 = vpack.c.bf16 %v875_v20, %v872_v19  ;;  %2604 = vmatprep.subr.bf16.mxu1 %v2988_v23  ;;  %v2950_v19 = vld [vmem:[%s3715_s3 + $0x278] sm:$0xff]   ;;  %v2951_v22 = vld [vmem:[%s3715_s3 + $0xa0] sm:$0xff]  }
 0x29a   :  { %v3390_v26 = vpop.f32.mrf.mxu1 }
 0x29b   :  { %v1349_v28 = vrot.slane %v3387_v25, 4  ;;  %v880_v58 = vadd.f32 %v3358_v56, %v3390_v26  ;;  %v2934_v56 = vld [vmem:[%s3715_s3 + $0x1f8] sm:$0xff]  }
 0x29c   :  { %2605 = vmatpush3.bf16.msra.mxu1 %v2917_v24  ;;  %v2570_v30 = vpop.f32.mrf.mxu1  ;;  %v2952_v24 = vld [vmem:[%s3715_s3 + $0x270] sm:$0xff]   ;;  %v2953_v26 = vld [vmem:[%s3715_s3 + $0x98] sm:$0xff]  }
 0x29d   :  { %2677 = vmatmul.mubr.bf16.vlgmr.msra.gmra.mxu0 %v1349_v28  ;;  %2606 = vmatprep.subr.bf16.mxu1 %v2988_v23  ;;  %v2955_v28 = vld [vmem:[%s3715_s3 + $0x90] sm:$0xff]   ;;  %v2956_v30 = vld [vmem:[%s3715_s3 + $0x260] sm:$0xff]  }
 0x29e   :  { %2701 = vmatpush3.bf16.msra.mxu0 %v2918_v27  ;;  %v882_v32 = vpop.f32.mrf.mxu1  ;;  %2716 = vmatprep.mubr.msk.bf16.mxu0 %vm2989_vm0, %v2988_v23  ;;  %v2954_v27 = vld [vmem:[%s3715_s3 + $0x268] sm:$0xff]  }
 0x29f   :  { %2702 = vmatprep.subr.bf16.mxu0 %v2988_v23  ;;  %v883_v3 = vadd.f32 %v2431_v0, %v882_v32  ;;  %v2958_v32 = vld [vmem:[%s3715_s3 + $0x258] sm:$0xff]   ;;  %v2984_v0 = vld [vmem:[%s3715_s3 + $0x210] sm:$0xff]  }
 0x2a0   :  { %2607 = vmatpush3.bf16.msra.mxu1 %v2919_v31  ;;  %v2571_v34 = vpop.f32.mrf.mxu1  ;;  %v2957_v31 = vld [vmem:[%s3715_s3 + $0x88] sm:$0xff]  }
 0x2a1   :  { %2608 = vmatprep.subr.bf16.mxu1 %v2988_v23  ;;  %v3470_v29 = vpack.c.bf16 %v883_v3, %v880_v58  ;;  %v2960_v34 = vld [vmem:[%s3715_s3 + $0x250] sm:$0xff]   ;;  %v2986_v3 = vld [vmem:[%s3715_s3 + $0x200] sm:$0xff]  }
 0x2a2   :  { %2703 = vmatpush3.bf16.msra.mxu0 %v2920_v33  ;;  %v887_v37 = vpop.f32.mrf.mxu1  ;;  %v2959_v33 = vld [vmem:[%s3715_s3 + $0x80] sm:$0xff]  }
 0x2a3   :  { %2704 = vmatprep.subr.bf16.mxu0 %v2988_v23  ;;  %v888_v44 = vadd.f32 %v3364_v61, %v887_v37  ;;  %v2929_v61 = vld [vmem:[%s3715_s3 + $0x78] sm:$0xff]   ;;  %v2962_v37 = vld [vmem:[%s3715_s3 + $0x248] sm:$0xff]  }
 0x2a4   :  { %2609 = vmatpush3.bf16.msra.mxu1 %v2921_v35  ;;  %v2574_v39 = vpop.f32.mrf.mxu1  ;;  %v2961_v35 = vld [vmem:[%s3715_s3 + $0x138] sm:$0xff]  }
 0x2a5   :  { %2610 = vmatprep.subr.bf16.mxu1 %v2988_v23  ;;  %v2964_v39 = vld [vmem:[%s3715_s3 + $0x240] sm:$0xff]  }
 0x2a6   :  { %2705 = vmatpush3.bf16.msra.mxu0 %v2922_v38  ;;  %v890_v41 = vpop.f32.mrf.mxu1  ;;  %v2963_v38 = vld [vmem:[%s3715_s3 + $0x130] sm:$0xff]  }
 0x2a7   :  { %v891_v45 = vadd.f32 %v3366_v36, %v890_v41  ;;  %2706 = vmatprep.subr.bf16.mxu0 %v2988_v23  ;;  %v2966_v41 = vld [vmem:[%s3715_s3 + $0x120] sm:$0xff]  }
 0x2a8   :  { %2611 = vmatpush3.bf16.msra.mxu1 %v2923_v40  ;;  %v2575_v46 = vpop.f32.mrf.mxu1 }
 0x2a9   :  { %v3427_v48 = vpack.c.bf16 %v891_v45, %v888_v44  ;;  %2612 = vmatprep.subr.bf16.mxu1 %v2988_v23  ;;  %v2968_v44 = vld [vmem:[%s3715_s3 + $0x110] sm:$0xff]   ;;  %v2969_v45 = vld [vmem:[%s3715_s3 + $0x108] sm:$0xff]   ;;  %v2970_v46 = vld [vmem:[%s3715_s3 + $0x100] sm:$0xff]  }
 0x2aa   :  { %2707 = vmatpush3.bf16.msra.mxu0 %v2924_v42  ;;  %v895_v49 = vpop.f32.mrf.mxu1  ;;  %v2967_v42 = vld [vmem:[%s3715_s3 + $0x118] sm:$0xff]  }
 0x2ab   :  { %v896_v52 = vadd.f32 %v3368_v4, %v895_v49  ;;  %2708 = vmatprep.subr.bf16.mxu0 %v2988_v23  ;;  %v2931_v4 = vld [vmem:[%s3715_s3 + $0x70] sm:$0xff]   ;;  %v1779_v20 = vrot.slane %v3427_v48, 4 }
 0x2ac   :  { %2613 = vmatpush3.bf16.msra.mxu1 %v2925_v47  ;;  %v2578_v53 = vpop.f32.mrf.mxu1  ;;  %v2971_v47 = vld [vmem:[%s3715_s3 + $0x1b8] sm:$0xff]   ;;  %v2972_v49 = vld [vmem:[%s3715_s3 + $0x1b0] sm:$0xff]  }
 0x2ad   :  { %2614 = vmatprep.subr.bf16.mxu1 %v2988_v23  ;;  %v2975_v53 = vld [vmem:[%s3715_s3 + $0x198] sm:$0xff]  }
 0x2ae   :  { %2709 = vmatpush3.bf16.msra.mxu0 %v2926_v51  ;;  %v898_v55 = vpop.f32.mrf.mxu1  ;;  %v2973_v51 = vld [vmem:[%s3715_s3 + $0x1a8] sm:$0xff]  }
 0x2af   :  { %v899_v60 = vadd.f32 %v3370_v5, %v898_v55  ;;  %2710 = vmatprep.subr.bf16.mxu0 %v2988_v23  ;;  %v1564_v5 = vrot.slane %v3470_v29, 4  ;;  %v2977_v55 = vld [vmem:[%s3715_s3 + $0x188] sm:$0xff]  }
 0x2b0   :  { %2615 = vmatpush3.bf16.msra.mxu1 %v2927_v54  ;;  %v2579_v62 = vpop.f32.mrf.mxu1  ;;  %v2976_v54 = vld [vmem:[%s3715_s3 + $0x190] sm:$0xff]  }
 0x2b1   :  { %v3452_v36 = vpack.c.bf16 %v899_v60, %v896_v52  ;;  %2620 = vmatprep.subr.bf16.mxu1 %v2988_v23  ;;  %v2974_v52 = vld [vmem:[%s3715_s3 + $0x1a0] sm:$0xff]   ;;  %v2979_v60 = vld [vmem:[%s3715_s3 + $0x238] sm:$0xff]  }
 0x2b2   :  { %2711 = vmatpush3.bf16.msra.mxu0 %v2928_v50  ;;  %v2978_v50 = vld [vmem:[%s3715_s3 + $0x180] sm:$0xff]   ;;  %v2983_v62 = vld [vmem:[%s3715_s3 + $0x218] sm:$0xff]  }
 0x2b3   :  { %2617 = vmatmul.mubr.bf16.vlgmr.msra.gmra.mxu1 %v907_v43  ;;  %2712 = vmatprep.subr.bf16.mxu0 %v2988_v23  ;;  %v1994_v40 = vrot.slane %v3452_v36, 4  ;;  %v2980_v43 = vld [vmem:[%s3715_s3 + $0x230] sm:$0xff]  }
 0x2b4   :  { %2621 = vmatpush3.bf16.msra.mxu1 %v2929_v61  ;;  %2636 = vmatprep.mubr.msk.bf16.mxu1 %vm2989_vm0, %v2988_v23  ;;  %v2981_v61 = vld [vmem:[%s3715_s3 + $0x228] sm:$0xff]  }
 0x2b5   :  { %2622 = vmatprep.subr.bf16.mxu1 %v2988_v23 }
 0x2b6   :  { %2713 = vmatpush3.bf16.msra.mxu0 %v2930_v2  ;;  %v2985_v2 = vld [vmem:[%s3715_s3 + $0x208] sm:$0xff]  }
 0x2b7   :  { %2714 = vmatprep.subr.bf16.mxu0 %v2988_v23 }
 0x2b8   :  { %2623 = vmatpush3.bf16.msra.mxu1 %v2931_v4 }
 0x2b9   :  { %2624 = vmatprep.subr.bf16.mxu1 %v2988_v23 }
 0x2ba   :  { %2715 = vmatpush3.bf16.msra.mxu0 %v2932_v59 }
 0x2bb   :  { %2740 = vmatprep.subr.bf16.mxu0 %v2988_v23 }
 0x2bc   :  { %2625 = vmatpush3.bf16.msra.mxu1 %v2933_v21 }
 0x2bd   :  { %2717 = vmatmul.mubr.bf16.vlgmr.msra.gmra.mxu0 %v1564_v5  ;;  %2626 = vmatprep.subr.bf16.mxu1 %v2988_v23 }
 0x2be   :  { %2741 = vmatpush3.bf16.msra.mxu0 %v2934_v56  ;;  %2756 = vmatprep.mubr.msk.bf16.mxu0 %vm2989_vm0, %v2988_v23 }
 0x2bf   :  { %2742 = vmatprep.subr.bf16.mxu0 %v2988_v23 }
 0x2c0   :  { %2627 = vmatpush3.bf16.msra.mxu1 %v2935_v13 }
 0x2c1   :  { %2628 = vmatprep.subr.bf16.mxu1 %v2988_v23 }
 0x2c2   :  { %2743 = vmatpush3.bf16.msra.mxu0 %v2936_v7 }
 0x2c3   :  { %2744 = vmatprep.subr.bf16.mxu0 %v2988_v23 }
 0x2c4   :  { %2629 = vmatpush3.bf16.msra.mxu1 %v2937_v1 }
 0x2c5   :  { %2630 = vmatprep.subr.bf16.mxu1 %v2988_v23 }
 0x2c6   :  { %2745 = vmatpush3.bf16.msra.mxu0 %v2938_v8 }
 0x2c7   :  { %2746 = vmatprep.subr.bf16.mxu0 %v2988_v23 }
 0x2c8   :  { %2631 = vmatpush3.bf16.msra.mxu1 %v2939_v6 }
 0x2c9   :  { %2632 = vmatprep.subr.bf16.mxu1 %v2988_v23 }
 0x2ca   :  { %2747 = vmatpush3.bf16.msra.mxu0 %v2940_v57 }
 0x2cb   :  { %2748 = vmatprep.subr.bf16.mxu0 %v2988_v23 }
 0x2cc   :  { %2633 = vmatpush3.bf16.msra.mxu1 %v2941_v9 }
 0x2cd   :  { %2634 = vmatprep.subr.bf16.mxu1 %v2988_v23 }
 0x2ce   :  { %2749 = vmatpush3.bf16.msra.mxu0 %v2942_v10 }
 0x2cf   :  { %2750 = vmatprep.subr.bf16.mxu0 %v2988_v23 }
 0x2d0   :  { %2635 = vmatpush3.bf16.msra.mxu1 %v2943_v63 }
 0x2d1   :  { %2640 = vmatprep.subr.bf16.mxu1 %v2988_v23 }
 0x2d2   :  { %2751 = vmatpush3.bf16.msra.mxu0 %v2944_v12 }
 0x2d3   :  { %2637 = vmatmul.mubr.bf16.vlgmr.msra.gmra.mxu1 %v1134_v15  ;;  %2752 = vmatprep.subr.bf16.mxu0 %v2988_v23 }
 0x2d4   :  { %2641 = vmatpush3.bf16.msra.mxu1 %v2945_v14  ;;  %2656 = vmatprep.mubr.msk.bf16.mxu1 %vm2989_vm0, %v2988_v23 }
 0x2d5   :  { %2642 = vmatprep.subr.bf16.mxu1 %v2988_v23 }
 0x2d6   :  { %2753 = vmatpush3.bf16.msra.mxu0 %v2946_v16 }
 0x2d7   :  { %2754 = vmatprep.subr.bf16.mxu0 %v2988_v23 }
 0x2d8   :  { %2643 = vmatpush3.bf16.msra.mxu1 %v2947_v17 }
 0x2d9   :  { %2644 = vmatprep.subr.bf16.mxu1 %v2988_v23 }
 0x2da   :  { %2755 = vmatpush3.bf16.msra.mxu0 %v2948_v11 }
 0x2db   :  { %2780 = vmatprep.subr.bf16.mxu0 %v2988_v23 }
 0x2dc   :  { %2645 = vmatpush3.bf16.msra.mxu1 %v2949_v18 }
 0x2dd   :  { %2757 = vmatmul.mubr.bf16.vlgmr.msra.gmra.mxu0 %v1779_v20  ;;  %2646 = vmatprep.subr.bf16.mxu1 %v2988_v23 }
 0x2de   :  { %2781 = vmatpush3.bf16.msra.mxu0 %v2950_v19  ;;  %2796 = vmatprep.mubr.msk.bf16.mxu0 %vm2989_vm0, %v2988_v23 }
 0x2df   :  { %2782 = vmatprep.subr.bf16.mxu0 %v2988_v23 }
 0x2e0   :  { %2647 = vmatpush3.bf16.msra.mxu1 %v2951_v22 }
 0x2e1   :  { %2648 = vmatprep.subr.bf16.mxu1 %v2988_v23 }
 0x2e2   :  { %2783 = vmatpush3.bf16.msra.mxu0 %v2952_v24 }
 0x2e3   :  { %2784 = vmatprep.subr.bf16.mxu0 %v2988_v23 }
 0x2e4   :  { %2649 = vmatpush3.bf16.msra.mxu1 %v2953_v26 }
 0x2e5   :  { %2650 = vmatprep.subr.bf16.mxu1 %v2988_v23 }
 0x2e6   :  { %2785 = vmatpush3.bf16.msra.mxu0 %v2954_v27 }
 0x2e7   :  { %2786 = vmatprep.subr.bf16.mxu0 %v2988_v23 }
 0x2e8   :  { %2651 = vmatpush3.bf16.msra.mxu1 %v2955_v28 }
 0x2e9   :  { %2652 = vmatprep.subr.bf16.mxu1 %v2988_v23 }
 0x2ea   :  { %2787 = vmatpush3.bf16.msra.mxu0 %v2956_v30 }
 0x2eb   :  { %2788 = vmatprep.subr.bf16.mxu0 %v2988_v23 }
 0x2ec   :  { %2653 = vmatpush3.bf16.msra.mxu1 %v2957_v31 }
 0x2ed   :  { %2654 = vmatprep.subr.bf16.mxu1 %v2988_v23 }
 0x2ee   :  { %2789 = vmatpush3.bf16.msra.mxu0 %v2958_v32 }
 0x2ef   :  { %2790 = vmatprep.subr.bf16.mxu0 %v2988_v23 }
 0x2f0   :  { %2655 = vmatpush3.bf16.msra.mxu1 %v2959_v33 }
 0x2f1   :  { %2680 = vmatprep.subr.bf16.mxu1 %v2988_v23 }
 0x2f2   :  { %2791 = vmatpush3.bf16.msra.mxu0 %v2960_v34 }
 0x2f3   :  { %2657 = vmatmul.mubr.bf16.vlgmr.msra.gmra.mxu1 %v3387_v25  ;;  %2792 = vmatprep.subr.bf16.mxu0 %v2988_v23  ;;  %v2965_v25 = vld [vmem:[%s3715_s3 + $0x128] sm:$0xff]  }
 0x2f4   :  { %2681 = vmatpush3.bf16.msra.mxu1 %v2961_v35  ;;  %2696 = vmatprep.mubr.msk.bf16.mxu1 %vm2989_vm0, %v2988_v23 }
 0x2f5   :  { %2682 = vmatprep.subr.bf16.mxu1 %v2988_v23 }
 0x2f6   :  { %2793 = vmatpush3.bf16.msra.mxu0 %v2962_v37 }
 0x2f7   :  { %2794 = vmatprep.subr.bf16.mxu0 %v2988_v23 }
 0x2f8   :  { %2683 = vmatpush3.bf16.msra.mxu1 %v2963_v38 }
 0x2f9   :  { %2684 = vmatprep.subr.bf16.mxu1 %v2988_v23 }
 0x2fa   :  { %2795 = vmatpush3.bf16.msra.mxu0 %v2964_v39 }
 0x2fc   :  { %2685 = vmatpush3.bf16.msra.mxu1 %v2965_v25 }
 0x2fd   :  { %2797 = vmatmul.mubr.bf16.vlgmr.msra.gmra.mxu0 %v1994_v40  ;;  %2686 = vmatprep.subr.bf16.mxu1 %v2988_v23 }
 0x300   :  { %2687 = vmatpush3.bf16.msra.mxu1 %v2966_v41 }
 0x301   :  { %2688 = vmatprep.subr.bf16.mxu1 %v2988_v23 }
 0x304   :  { %2689 = vmatpush3.bf16.msra.mxu1 %v2967_v42 }
 0x305   :  { %2690 = vmatprep.subr.bf16.mxu1 %v2988_v23 }
 0x308   :  { %2691 = vmatpush3.bf16.msra.mxu1 %v2968_v44 }
 0x309   :  { %2692 = vmatprep.subr.bf16.mxu1 %v2988_v23 }
 0x30c   :  { %2693 = vmatpush3.bf16.msra.mxu1 %v2969_v45 }
 0x30d   :  { %2694 = vmatprep.subr.bf16.mxu1 %v2988_v23 }
 0x310   :  { %2695 = vmatpush3.bf16.msra.mxu1 %v2970_v46 }
 0x311   :  { %2720 = vmatprep.subr.bf16.mxu1 %v2988_v23 }
 0x313   :  { %2697 = vmatmul.mubr.bf16.vlgmr.msra.gmra.mxu1 %v3470_v29 }
 0x314   :  { %2721 = vmatpush3.bf16.msra.mxu1 %v2971_v47  ;;  %2736 = vmatprep.mubr.msk.bf16.mxu1 %vm2989_vm0, %v2988_v23 }
 0x315   :  { %2722 = vmatprep.subr.bf16.mxu1 %v2988_v23 }
 0x318   :  { %2723 = vmatpush3.bf16.msra.mxu1 %v2972_v49 }
 0x319   :  { %2724 = vmatprep.subr.bf16.mxu1 %v2988_v23 }
 0x31c   :  { %2725 = vmatpush3.bf16.msra.mxu1 %v2973_v51 }
 0x31d   :  { %2726 = vmatprep.subr.bf16.mxu1 %v2988_v23 }
 0x320   :  { %2727 = vmatpush3.bf16.msra.mxu1 %v2974_v52 }
 0x321   :  { %2728 = vmatprep.subr.bf16.mxu1 %v2988_v23 }
 0x324   :  { %2729 = vmatpush3.bf16.msra.mxu1 %v2975_v53 }
 0x325   :  { %2730 = vmatprep.subr.bf16.mxu1 %v2988_v23 }
 0x328   :  { %2731 = vmatpush3.bf16.msra.mxu1 %v2976_v54 }
 0x329   :  { %2732 = vmatprep.subr.bf16.mxu1 %v2988_v23 }
 0x32c   :  { %2733 = vmatpush3.bf16.msra.mxu1 %v2977_v55 }
 0x32d   :  { %2734 = vmatprep.subr.bf16.mxu1 %v2988_v23 }
 0x330   :  { %2735 = vmatpush3.bf16.msra.mxu1 %v2978_v50 }
 0x331   :  { %2760 = vmatprep.subr.bf16.mxu1 %v2988_v23 }
 0x333   :  { %2737 = vmatmul.mubr.bf16.vlgmr.msra.gmra.mxu1 %v3427_v48  ;;  %v2982_v48 = vld [vmem:[%s3715_s3 + $0x220] sm:$0xff]  }
 0x334   :  { %2761 = vmatpush3.bf16.msra.mxu1 %v2979_v60  ;;  %2776 = vmatprep.mubr.msk.bf16.mxu1 %vm2989_vm0, %v2988_v23 }
 0x335   :  { %2762 = vmatprep.subr.bf16.mxu1 %v2988_v23 }
 0x338   :  { %2763 = vmatpush3.bf16.msra.mxu1 %v2980_v43 }
 0x339   :  { %2764 = vmatprep.subr.bf16.mxu1 %v2988_v23 }
 0x33c   :  { %2765 = vmatpush3.bf16.msra.mxu1 %v2981_v61 }
 0x33d   :  { %2766 = vmatprep.subr.bf16.mxu1 %v2988_v23 }
 0x340   :  { %2767 = vmatpush3.bf16.msra.mxu1 %v2982_v48 }
 0x341   :  { %2768 = vmatprep.subr.bf16.mxu1 %v2988_v23 }
 0x344   :  { %2769 = vmatpush3.bf16.msra.mxu1 %v2983_v62 }
 0x345   :  { %2770 = vmatprep.subr.bf16.mxu1 %v2988_v23 }
 0x348   :  { %2771 = vmatpush3.bf16.msra.mxu1 %v2984_v0 }
 0x349   :  { %2772 = vmatprep.subr.bf16.mxu1 %v2988_v23 }
 0x34c   :  { %2773 = vmatpush3.bf16.msra.mxu1 %v2985_v2 }
 0x34d   :  { %2774 = vmatprep.subr.bf16.mxu1 %v2988_v23 }
 0x350   :  { %2775 = vmatpush3.bf16.msra.mxu1 %v2986_v3 }
 0x353   :  { %2777 = vmatmul.mubr.bf16.vlgmr.msra.gmra.mxu1 %v3452_v36  ;;  %v1022_v4 = vpop.f32.mrf.mxu1 }
 0x355   :  { %v2598_v58 = vpop.f32.mrf.mxu1 }
 0x357   :  { %v1025_v59 = vpop.f32.mrf.mxu1 }
 0x359   :  { %v2599_v29 = vpop.f32.mrf.mxu1 }
 0x35d   :  { %v1433_v21 = vpop.f32.mrf.mxu0 }
 0x35f   :  { %v2678_v56 = vpop.f32.mrf.mxu0 }
 0x361   :  { %v1436_v5 = vpop.f32.mrf.mxu0 }
 0x363   :  { %v2679_v13 = vpop.f32.mrf.mxu0 }
 0x373   :  { %v1110_v7 = vpop.f32.mrf.mxu1 }
 0x374   :  { %v1111_v1 = vadd.f32 %v1110_v7, %v1022_v4 }
 0x375   :  { %v2618_v8 = vpop.f32.mrf.mxu1 }
 0x377   :  { %v1113_v6 = vpop.f32.mrf.mxu1 }
 0x379   :  { %v2619_v57 = vpop.f32.mrf.mxu1 }
 0x37d   :  { %v1648_v9 = vpop.f32.mrf.mxu0 }
 0x37f   :  { %v2718_v10 = vpop.f32.mrf.mxu0 }
 0x381   :  { %v1651_v63 = vpop.f32.mrf.mxu0 }
 0x383   :  { %v2719_v23 = vpop.f32.mrf.mxu0 }
 0x393   :  { %v1218_v12 = vpop.f32.mrf.mxu1 }
 0x394   :  { %v1224_v14 = vadd.f32 %v1218_v12, %v1111_v1 }
 0x395   :  { %v2638_v36 = vpop.f32.mrf.mxu1 }
 0x397   :  { %v1221_v15 = vpop.f32.mrf.mxu1 }
 0x399   :  { %v2639_v16 = vpop.f32.mrf.mxu1 }
 0x39d   :  { %v1863_v17 = vpop.f32.mrf.mxu0 }
 0x39f   :  { %v2758_v11 = vpop.f32.mrf.mxu0 }
 0x3a1   :  { %v1866_v18 = vpop.f32.mrf.mxu0 }
 0x3a3   :  { %v2759_v19 = vpop.f32.mrf.mxu0 }
 0x3b3   :  { %v1324_v20 = vpop.f32.mrf.mxu1 }
 0x3b4   :  { %v1330_v22 = vadd.f32 %v1324_v20, %v1224_v14 }
 0x3b5   :  { %v2658_v24 = vpop.f32.mrf.mxu1 }
 0x3b6   :  { %v1439_v41 = vadd.f32 %v1433_v21, %v1330_v22 }
 0x3b7   :  { %v1327_v26 = vpop.f32.mrf.mxu1 }
 0x3b9   :  { %v2659_v27 = vpop.f32.mrf.mxu1 }
 0x3bd   :  { %v2078_v28 = vpop.f32.mrf.mxu0 }
 0x3bf   :  { %v2798_v30 = vpop.f32.mrf.mxu0 }
 0x3c1   :  { %v2081_v31 = vpop.f32.mrf.mxu0 }
 0x3c3   :  { %v2799_v32 = vpop.f32.mrf.mxu0 }
 0x3d3   :  { %v1539_v33 = vpop.f32.mrf.mxu1 }
 0x3d4   :  { %v1545_v42 = vadd.f32 %v1539_v33, %v1439_v41 }
 0x3d5   :  { %v2698_v34 = vpop.f32.mrf.mxu1 }
 0x3d6   :  { %v1654_v44 = vadd.f32 %v1648_v9, %v1545_v42 }
 0x3d7   :  { %v1542_v35 = vpop.f32.mrf.mxu1 }
 0x3d9   :  { %v2699_v37 = vpop.f32.mrf.mxu1 }
 0x3f3   :  { %v1754_v38 = vpop.f32.mrf.mxu1 }
 0x3f4   :  { %v1760_v45 = vadd.f32 %v1754_v38, %v1654_v44 }
 0x3f5   :  { %v2738_v39 = vpop.f32.mrf.mxu1 }
 0x3f6   :  { %v1869_v46 = vadd.f32 %v1863_v17, %v1760_v45 }
 0x3f7   :  { %v1757_v25 = vpop.f32.mrf.mxu1 }
 0x3f9   :  { %v2739_v40 = vpop.f32.mrf.mxu1 }
 0x413   :  { %v1969_v47 = vpop.f32.mrf.mxu1 }
 0x414   :  { %v1975_v49 = vadd.f32 %v1969_v47, %v1869_v46 }
 0x415   :  { %v2778_v51 = vpop.f32.mrf.mxu1 }
 0x416   :  { %v2084_v52 = vadd.f32 %v2078_v28, %v1975_v49 }
 0x417   :  { %v1972_v53 = vpop.f32.mrf.mxu1 }
 0x418   :  { %2085 = vst [vmem:[%s3718_s6] sm:$0xff] %v2084_v52 }
 0x419   :  { %v2779_v54 = vpop.f32.mrf.mxu1 }

</bundles_post_ra>
